<compile_context>
chip_gen: v6e
topology: v6e:2x2x1
jax: 0.10.0
libtpu: 0.0.40
codegen_flags: <defaults>
</compile_context>

<pallas_src>
import numpy as np
import jax
import jax.numpy as jnp
from jax import lax
from jax.experimental import pallas as pl
from jax.experimental.pallas import tpu as pltpu


def _round_up(x, m):
    return (x + m - 1) // m * m


def make_convlstm_call(T, TT, B, H, W, CIN, COUT, KHI, KWI, KHO, KWO):
    """Build the pallas_call for one ConvLSTM layer (channel-major flat layout)."""
    assert T % TT == 0
    PHO, PWO = KHO // 2, KWO // 2
    BHW = B * H * W
    KIN = _round_up(KHI * KWI * CIN + 1, 8)  # im2col K (+1 bias row), sublane-padded
    KH = KHO * KWO * COUT                    # recurrent im2col K
    G = 4 * COUT                             # fused gate channels (i, f, c, o)
    NK = KHO * KWO

    # Static per-tap metadata for the recurrent conv: flat lane offset and a
    # border-validity mask (precomputed on host, passed in as a tiny array).
    offs, masks, trivial = [], [], []
    hh = np.arange(H)[:, None]
    ww = np.arange(W)[None, :]
    for dh in range(KHO):
        for dw in range(KWO):
            offs.append((dh - PHO) * W + (dw - PWO))
            mh = (hh + dh - PHO >= 0) & (hh + dh - PHO < H)
            mw = (ww + dw - PWO >= 0) & (ww + dw - PWO < W)
            m = (mh & mw).astype(np.float32)              # (H, W)
            trivial.append(bool(m.all()))
            masks.append(np.tile(m.reshape(-1), B))       # (B*H*W,)
    mask_np = np.stack(masks, axis=0)                     # (NK, BHW)

    def kernel(xcol_ref, wx_ref, wh_ref, mask_ref, h0_ref, c0_ref,
               out_ref, h_scr, c_scr):
        @pl.when(pl.program_id(0) == 0)
        def _init():
            h_scr[...] = h0_ref[...]
            c_scr[...] = c0_ref[...]

        wx = wx_ref[...]                                  # (G, KIN)
        wh = wh_ref[...]                                  # (G, KH)
        mask_rows = [None if trivial[k] else mask_ref[k:k + 1, :]
                     for k in range(NK)]                  # (1, BHW) each

        for tt in range(TT):                              # TT timesteps per grid step
            # Input conv + combined biases: ONE fused MXU matmul
            # (bias folded in via the ones-row / bias-column).
            gates = jnp.dot(wx, xcol_ref[tt],
                            preferred_element_type=jnp.float32)  # (G, BHW)

            # Recurrent conv: in-kernel im2col of the hidden state via lane
            # rolls (XLU) + border masks, then ONE fused matmul.
            h = h_scr[...]                                # (COUT, BHW)
            pieces = []
            for k in range(NK):
                off = offs[k]
                hs = h if off == 0 else pltpu.roll(h, shift=(-off) % BHW, axis=1)
                if mask_rows[k] is not None:
                    hs = hs * mask_rows[k]
                pieces.append(hs)
            h_col = jnp.concatenate(pieces, axis=0)       # (KH, BHW)
            gates = gates + jnp.dot(wh, h_col,
                                    preferred_element_type=jnp.float32)

            in_gate = jax.nn.sigmoid(gates[0 * COUT:1 * COUT])
            forget_gate = jax.nn.sigmoid(gates[1 * COUT:2 * COUT])
            c_hat = jnp.tanh(gates[2 * COUT:3 * COUT])
            out_gate = jax.nn.sigmoid(gates[3 * COUT:4 * COUT])

            cell = forget_gate * c_scr[...] + in_gate * c_hat
            hidden = out_gate * jnp.tanh(cell)

            c_scr[...] = cell
            h_scr[...] = hidden
            out_ref[tt] = hidden                          # dense (8,128)-tiled store

    grid_spec = pltpu.PrefetchScalarGridSpec(
        num_scalar_prefetch=0,
        grid=(T // TT,),
        in_specs=[
            # im2col'ed input frames (+ bias/pad rows), TT steps per grid step
            pl.BlockSpec((TT, KIN, BHW), lambda g: (g, 0, 0)),
            # fused input-conv weights (4 gates, all taps, + bias column)
            pl.BlockSpec((G, KIN), lambda g: (0, 0)),
            # fused recurrent-conv weights (4 gates, all taps)
            pl.BlockSpec((G, KH), lambda g: (0, 0)),
            # border masks for the recurrent taps
            pl.BlockSpec((NK, BHW), lambda g: (0, 0)),
            # initial hidden / cell state, channel-major flat layout
            pl.BlockSpec((COUT, BHW), lambda g: (0, 0)),
            pl.BlockSpec((COUT, BHW), lambda g: (0, 0)),
        ],
        out_specs=pl.BlockSpec((TT, COUT, BHW), lambda g: (g, 0, 0)),
        scratch_shapes=[
            pltpu.VMEM((COUT, BHW), jnp.float32),   # hidden state (persists over grid)
            pltpu.VMEM((COUT, BHW), jnp.float32),   # cell state
        ],
    )

    call = pl.pallas_call(
        kernel,
        out_shape=jax.ShapeDtypeStruct((T, COUT, BHW), jnp.float32),
        grid_spec=grid_spec,
        compiler_params=pltpu.CompilerParams(
            dimension_semantics=("arbitrary",)),    # time recurrence: sequential
    )

    mask = jnp.asarray(mask_np)

    def run(x_col, wx, wh, h0_flat, c0_flat):
        return call(x_col, wx, wh, mask, h0_flat, c0_flat)

    return run


def convlstm_forward(X, Wx_list, bx_list, Wh_list, bh_list, h0, c0,
                     in_kernel, out_kernel, time_block=None):
    """ConvLSTMCell1.forward.  X: (T, B, Cin, H, W) f32 -> (T, B, Cout, H, W)."""
    T, B, CIN, H, W = X.shape
    COUT = Wx_list[0].shape[0]
    KHI, KWI = in_kernel
    KHO, KWO = out_kernel
    PHI, PWI = KHI // 2, KWI // 2
    HW = H * W
    BHW = B * HW
    KHW = KHI * KWI
    KIN = _round_up(KHW * CIN + 1, 8)
    pad_rows = KIN - (KHW * CIN + 1)

    # TODO(synk): generalize via wrapper-side padding when these don't hold.
    assert BHW % 128 == 0, "B*H*W must be a multiple of 128 (lane width)"
    assert COUT % 8 == 0, "out_channels must be a multiple of 8 (sublane width)"

    if time_block is None:
        time_block = max(d for d in range(1, min(T, 4) + 1) if T % d == 0)
    TT = time_block

    # --- im2col of the input sequence (done once, outside the kernel) ---
    x_pad = jnp.pad(X.astype(jnp.float32),
                    ((0, 0), (0, 0), (0, 0), (PHI, PHI), (PWI, PWI)))
    patches = [x_pad[:, :, :, dh:dh + H, dw:dw + W]
               for dh in range(KHI) for dw in range(KWI)]     # each (T,B,CIN,H,W)
    x_col = jnp.stack(patches, axis=2)                        # (T,B,KHW,CIN,H,W)
    x_col = x_col.reshape(T, B, KHW * CIN, HW)
    x_col = jnp.transpose(x_col, (0, 2, 1, 3)).reshape(T, KHW * CIN, BHW)
    x_extra = jnp.concatenate(                                # ones (bias) + zero pad
        [jnp.ones((T, 1, BHW), jnp.float32),
         jnp.zeros((T, pad_rows, BHW), jnp.float32)], axis=1)
    x_col = jnp.concatenate([x_col, x_extra], axis=1)         # (T, KIN, BHW)

    # --- fused weights: gates stacked on rows, taps*channel flattened on cols ---
    def fuse(w_list, cin):
        w = jnp.concatenate([jnp.asarray(w, jnp.float32) for w in w_list], axis=0)
        kh, kw = w.shape[2], w.shape[3]
        return jnp.transpose(w, (0, 2, 3, 1)).reshape(4 * COUT, kh * kw * cin)

    wx = fuse(Wx_list, CIN)                                   # (4*COUT, KHW*CIN)
    wh = fuse(Wh_list, COUT)                                  # (4*COUT, KHO*KWO*COUT)
    bias = jnp.concatenate([jnp.asarray(bx, jnp.float32) + jnp.asarray(bh, jnp.float32)
                            for bx, bh in zip(bx_list, bh_list)], axis=0)
    w_extra = jnp.concatenate([bias[:, None],
                               jnp.zeros((4 * COUT, pad_rows), jnp.float32)], axis=1)
    wx = jnp.concatenate([wx, w_extra], axis=1)               # (4*COUT, KIN)

    # --- initial state, channel-major flat (COUT, B*H*W), repeated over batch ---
    def flat_state(s):
        return jnp.tile(jnp.asarray(s, jnp.float32).reshape(COUT, HW), (1, B))

    run = make_convlstm_call(T, TT, B, H, W, CIN, COUT, KHI, KWI, KHO, KWO)
    out = run(x_col, wx, wh, flat_state(h0), flat_state(c0))  # (T, COUT, BHW)
    out = out.reshape(T, COUT, B, H, W).transpose(0, 2, 1, 3, 4)
    return out  # (T, B, COUT, H, W)


def ref_forward(X, Wx_list, bx_list, Wh_list, bh_list, h0, c0, in_pad, out_pad):
    """Pure-JAX reference mirroring the PyTorch module (NCHW convs, HIGHEST)."""
    T, B, CIN, H, W = X.shape
    COUT = h0.shape[0]
    dn = ('NCHW', 'OIHW', 'NCHW')

    def conv(x, w, bias, pad):
        y = lax.conv_general_dilated(
            x, w, window_strides=(1, 1),
            padding=((pad[0], pad[0]), (pad[1], pad[1])),
            dimension_numbers=dn, precision=lax.Precision.HIGHEST)
        return y + bias[None, :, None, None]

    Wxi, Wxf, Wxc, Wxo = Wx_list
    Whi, Whf, Whc, Who = Wh_list
    bxi, bxf, bxc, bxo = bx_list
    bhi, bhf, bhc, bho = bh_list

    hidden = jnp.broadcast_to(h0[None], (B, COUT, H, W))
    cell = jnp.broadcast_to(c0[None], (B, COUT, H, W))
    outs = []
    for t in range(T):
        frame = X[t]
        in_gate = jax.nn.sigmoid(conv(frame, Wxi, bxi, in_pad)
                                 + conv(hidden, Whi, bhi, out_pad))
        forget_gate = jax.nn.sigmoid(conv(frame, Wxf, bxf, in_pad)
                                     + conv(hidden, Whf, bhf, out_pad))
        c_hat = jnp.tanh(conv(frame, Wxc, bxc, in_pad)
                         + conv(hidden, Whc, bhc, out_pad))
        cell = forget_gate * cell + in_gate * c_hat
        out_gate = jax.nn.sigmoid(conv(frame, Wxo, bxo, in_pad)
                                  + conv(hidden, Who, bho, out_pad))
        hidden = out_gate * jnp.tanh(cell)
        outs.append(hidden)
    return jnp.stack(outs, axis=0)


if __name__ == "__main__":
    # Small shapes: X is (T, B, Cin, H, W); B*H*W = 128 = one lane width.
    T, B = 8, 2
    CIN, COUT = 4, 8
    H = W = 8
    in_kernel = (3, 3)
    out_kernel = (3, 3)
    in_pad = (in_kernel[0] // 2, in_kernel[1] // 2)
    out_pad = (out_kernel[0] // 2, out_kernel[1] // 2)

    key = jax.random.PRNGKey(0)
    keys = jax.random.split(key, 20)

    def filt(k, shape, scale):
        return scale * jax.random.normal(k, shape, dtype=jnp.float32)

    in_shape = (COUT, CIN, *in_kernel)      # (out_ch, in_ch, kh, kw)
    out_shape_w = (COUT, COUT, *out_kernel)

    # Larger init scales / nonzero biases & initial state than the module's
    # default init so the recurrent and bias paths contribute visibly to the
    # numeric check; forward semantics are identical.
    Wxi = filt(keys[0], in_shape, 0.05); Whi = filt(keys[1], out_shape_w, 0.05)
    Wxf = filt(keys[2], in_shape, 0.05); Whf = filt(keys[3], out_shape_w, 0.05)
    Wxc = filt(keys[4], in_shape, 0.05); Whc = filt(keys[5], out_shape_w, 0.05)
    Wxo = filt(keys[6], in_shape, 0.05); Who = filt(keys[7], out_shape_w, 0.05)

    bxi = filt(keys[8], (COUT,), 0.2);  bhi = filt(keys[9], (COUT,), 0.2)
    bxf = filt(keys[10], (COUT,), 0.2); bhf = filt(keys[11], (COUT,), 0.2)
    bxc = filt(keys[12], (COUT,), 0.2); bhc = filt(keys[13], (COUT,), 0.2)
    bxo = filt(keys[14], (COUT,), 0.2); bho = filt(keys[15], (COUT,), 0.2)

    h0 = filt(keys[16], (COUT, H, W), 0.5)
    c0 = filt(keys[17], (COUT, H, W), 0.5)
    X = jax.random.normal(keys[18], (T, B, CIN, H, W), dtype=jnp.float32)

    Wx_list = (Wxi, Wxf, Wxc, Wxo)
    Wh_list = (Whi, Whf, Whc, Who)
    bx_list = (bxi, bxf, bxc, bxo)
    bh_list = (bhi, bhf, bhc, bho)

    out = convlstm_forward(X, Wx_list, bx_list, Wh_list, bh_list, h0, c0,
                           in_kernel, out_kernel)
    out = jax.block_until_ready(out)

    ref = ref_forward(X, Wx_list, bx_list, Wh_list, bh_list, h0, c0,
                      in_pad, out_pad)
    ref = jax.block_until_ready(ref)

    # Kernel matmuls use default (reduced) MXU precision; reference is HIGHEST.
    np.testing.assert_allclose(np.asarray(out), np.asarray(ref),
                               rtol=2e-2, atol=2e-2)
    print("KERNEL_OK")
</pallas_src>

<mosaic_0001>
module attributes {stable_mosaic.version = 11 : i64} {
  func.func @kernel(%arg0: i32, %arg1: memref<4x40x128xf32, #tpu.memory_space<vmem>>, %arg2: memref<32x40xf32, #tpu.memory_space<vmem>>, %arg3: memref<32x72xf32, #tpu.memory_space<vmem>>, %arg4: memref<9x128xf32, #tpu.memory_space<vmem>>, %arg5: memref<8x128xf32, #tpu.memory_space<vmem>>, %arg6: memref<8x128xf32, #tpu.memory_space<vmem>>, %arg7: memref<4x8x128xf32, #tpu.memory_space<vmem>>, %arg8: memref<8x128xf32, #tpu.memory_space<vmem>>, %arg9: memref<8x128xf32, #tpu.memory_space<vmem>>) attributes {dimension_semantics = [#tpu.dimension_semantics<arbitrary>], iteration_bounds = array<i64: 2>, scalar_prefetch = 0 : i64, scratch_operands = 2 : i64, tpu.core_type = #tpu.core_type<tc>, window_params = [{transform_indices = @transform_0, window_bounds = array<i64: 4, 40, 128>}, {pipeline_mode = #tpu.pipeline_mode<synchronous>, transform_indices = @transform_1, window_bounds = array<i64: 32, 40>}, {pipeline_mode = #tpu.pipeline_mode<synchronous>, transform_indices = @transform_2, window_bounds = array<i64: 32, 72>}, {pipeline_mode = #tpu.pipeline_mode<synchronous>, transform_indices = @transform_3, window_bounds = array<i64: 9, 128>}, {pipeline_mode = #tpu.pipeline_mode<synchronous>, transform_indices = @transform_4, window_bounds = array<i64: 8, 128>}, {pipeline_mode = #tpu.pipeline_mode<synchronous>, transform_indices = @transform_5, window_bounds = array<i64: 8, 128>}, {transform_indices = @transform_6, window_bounds = array<i64: 4, 8, 128>}]} {
    %c0_i32 = arith.constant 0 : i32
    %0 = arith.cmpi eq, %arg0, %c0_i32 : i32
    %1 = arith.extui %0 : i1 to i32
    %c0_i32_0 = arith.constant 0 : i32
    %2 = arith.cmpi ne, %1, %c0_i32_0 : i32
    scf.if %2 {
      %c0_112 = arith.constant 0 : index
      %c0_113 = arith.constant 0 : index
      %261 = vector.load %arg5[%c0_112, %c0_113] : memref<8x128xf32, #tpu.memory_space<vmem>>, vector<8x128xf32>
      %c0_114 = arith.constant 0 : index
      %c0_115 = arith.constant 0 : index
      %262 = vector.load %arg8[%c0_114, %c0_115] : memref<8x128xf32, #tpu.memory_space<vmem>>, vector<8x128xf32>
      tpu.vector_store %arg8[%c0_114, %c0_115], %261 {strides = array<i32>} : memref<8x128xf32, #tpu.memory_space<vmem>>, vector<8x128xf32>,
      %c0_116 = arith.constant 0 : index
      %c0_117 = arith.constant 0 : index
      %263 = vector.load %arg6[%c0_116, %c0_117] : memref<8x128xf32, #tpu.memory_space<vmem>>, vector<8x128xf32>
      %c0_118 = arith.constant 0 : index
      %c0_119 = arith.constant 0 : index
      %264 = vector.load %arg9[%c0_118, %c0_119] : memref<8x128xf32, #tpu.memory_space<vmem>>, vector<8x128xf32>
      tpu.vector_store %arg9[%c0_118, %c0_119], %263 {strides = array<i32>} : memref<8x128xf32, #tpu.memory_space<vmem>>, vector<8x128xf32>,
    } else {
    }
    %c0 = arith.constant 0 : index
    %c0_1 = arith.constant 0 : index
    %3 = vector.load %arg2[%c0, %c0_1] : memref<32x40xf32, #tpu.memory_space<vmem>>, vector<32x40xf32>
    %c0_2 = arith.constant 0 : index
    %c0_3 = arith.constant 0 : index
    %4 = vector.load %arg3[%c0_2, %c0_3] : memref<32x72xf32, #tpu.memory_space<vmem>>, vector<32x72xf32>
    %c0_4 = arith.constant 0 : index
    %c0_5 = arith.constant 0 : index
    %5 = vector.load %arg4[%c0_4, %c0_5] : memref<9x128xf32, #tpu.memory_space<vmem>>, vector<1x128xf32>
    %c1 = arith.constant 1 : index
    %c0_6 = arith.constant 0 : index
    %6 = vector.load %arg4[%c1, %c0_6] : memref<9x128xf32, #tpu.memory_space<vmem>>, vector<1x128xf32>
    %c2 = arith.constant 2 : index
    %c0_7 = arith.constant 0 : index
    %7 = vector.load %arg4[%c2, %c0_7] : memref<9x128xf32, #tpu.memory_space<vmem>>, vector<1x128xf32>
    %c3 = arith.constant 3 : index
    %c0_8 = arith.constant 0 : index
    %8 = vector.load %arg4[%c3, %c0_8] : memref<9x128xf32, #tpu.memory_space<vmem>>, vector<1x128xf32>
    %c5 = arith.constant 5 : index
    %c0_9 = arith.constant 0 : index
    %9 = vector.load %arg4[%c5, %c0_9] : memref<9x128xf32, #tpu.memory_space<vmem>>, vector<1x128xf32>
    %c6 = arith.constant 6 : index
    %c0_10 = arith.constant 0 : index
    %10 = vector.load %arg4[%c6, %c0_10] : memref<9x128xf32, #tpu.memory_space<vmem>>, vector<1x128xf32>
    %c7 = arith.constant 7 : index
    %c0_11 = arith.constant 0 : index
    %11 = vector.load %arg4[%c7, %c0_11] : memref<9x128xf32, #tpu.memory_space<vmem>>, vector<1x128xf32>
    %c8 = arith.constant 8 : index
    %c0_12 = arith.constant 0 : index
    %12 = vector.load %arg4[%c8, %c0_12] : memref<9x128xf32, #tpu.memory_space<vmem>>, vector<1x128xf32>
    %c0_13 = arith.constant 0 : index
    %c0_14 = arith.constant 0 : index
    %c0_15 = arith.constant 0 : index
    %13 = vector.load %arg1[%c0_13, %c0_14, %c0_15] : memref<4x40x128xf32, #tpu.memory_space<vmem>>, vector<1x40x128xf32>
    %14 = vector.shape_cast %13 : vector<1x40x128xf32> to vector<40x128xf32>
    %cst = arith.constant dense<0.000000e+00> : vector<32x128xf32>
    %15 = tpu.matmul %3, %14, %cst {dimension_numbers = #tpu.dot_dimension_numbers<[1], [0], [0], [1], [0, 0, 1, 1], [], []>} : vector<32x40xf32>, vector<40x128xf32>, vector<32x128xf32> -> vector<32x128xf32>
    %c0_16 = arith.constant 0 : index
    %c0_17 = arith.constant 0 : index
    %16 = vector.load %arg8[%c0_16, %c0_17] : memref<8x128xf32, #tpu.memory_space<vmem>>, vector<8x128xf32>
    %c9_i32 = arith.constant 9 : i32
    %17 = tpu.dynamic_rotate %16 by %c9_i32 dim 1 : vector<8x128xf32>, i32 -> vector<8x128xf32>
    %18 = vector.broadcast %5 : vector<1x128xf32> to vector<8x128xf32>
    %19 = arith.mulf %17, %18 : vector<8x128xf32>
    %c8_i32 = arith.constant 8 : i32
    %20 = tpu.dynamic_rotate %16 by %c8_i32 dim 1 : vector<8x128xf32>, i32 -> vector<8x128xf32>
    %21 = vector.broadcast %6 : vector<1x128xf32> to vector<8x128xf32>
    %22 = arith.mulf %20, %21 : vector<8x128xf32>
    %c7_i32 = arith.constant 7 : i32
    %23 = tpu.dynamic_rotate %16 by %c7_i32 dim 1 : vector<8x128xf32>, i32 -> vector<8x128xf32>
    %24 = vector.broadcast %7 : vector<1x128xf32> to vector<8x128xf32>
    %25 = arith.mulf %23, %24 : vector<8x128xf32>
    %c1_i32 = arith.constant 1 : i32
    %26 = tpu.dynamic_rotate %16 by %c1_i32 dim 1 : vector<8x128xf32>, i32 -> vector<8x128xf32>
    %27 = vector.broadcast %8 : vector<1x128xf32> to vector<8x128xf32>
    %28 = arith.mulf %26, %27 : vector<8x128xf32>
    %c127_i32 = arith.constant 127 : i32
    %29 = tpu.dynamic_rotate %16 by %c127_i32 dim 1 : vector<8x128xf32>, i32 -> vector<8x128xf32>
    %30 = vector.broadcast %9 : vector<1x128xf32> to vector<8x128xf32>
    %31 = arith.mulf %29, %30 : vector<8x128xf32>
    %c121_i32 = arith.constant 121 : i32
    %32 = tpu.dynamic_rotate %16 by %c121_i32 dim 1 : vector<8x128xf32>, i32 -> vector<8x128xf32>
    %33 = vector.broadcast %10 : vector<1x128xf32> to vector<8x128xf32>
    %34 = arith.mulf %32, %33 : vector<8x128xf32>
    %c120_i32 = arith.constant 120 : i32
    %35 = tpu.dynamic_rotate %16 by %c120_i32 dim 1 : vector<8x128xf32>, i32 -> vector<8x128xf32>
    %36 = vector.broadcast %11 : vector<1x128xf32> to vector<8x128xf32>
    %37 = arith.mulf %35, %36 : vector<8x128xf32>
    %c119_i32 = arith.constant 119 : i32
    %38 = tpu.dynamic_rotate %16 by %c119_i32 dim 1 : vector<8x128xf32>, i32 -> vector<8x128xf32>
    %39 = vector.broadcast %12 : vector<1x128xf32> to vector<8x128xf32>
    %40 = arith.mulf %38, %39 : vector<8x128xf32>
    %41 = tpu.concatenate %19, %22, %25, %28, %16, %31, %34, %37, %40 in 0 : vector<8x128xf32>, vector<8x128xf32>, vector<8x128xf32>, vector<8x128xf32>, vector<8x128xf32>, vector<8x128xf32>, vector<8x128xf32>, vector<8x128xf32>, vector<8x128xf32> -> vector<72x128xf32>
    %cst_18 = arith.constant dense<0.000000e+00> : vector<32x128xf32>
    %42 = tpu.matmul %4, %41, %cst_18 {dimension_numbers = #tpu.dot_dimension_numbers<[1], [0], [0], [1], [0, 0, 1, 1], [], []>} : vector<32x72xf32>, vector<72x128xf32>, vector<32x128xf32> -> vector<32x128xf32>
    %43 = arith.addf %15, %42 : vector<32x128xf32>
    %44 = vector.extract_strided_slice %43 {offsets = [0, 0], sizes = [8, 128], strides = [1, 1]} : vector<32x128xf32> to vector<8x128xf32>
    %45 = arith.negf %44 : vector<8x128xf32>
    %46 = math.exp %45 : vector<8x128xf32>
    %cst_19 = arith.constant 1.000000e+00 : f32
    %47 = vector.broadcast %cst_19 : f32 to vector<8x128xf32>
    %48 = arith.addf %47, %46 : vector<8x128xf32>
    %49 = arith.divf %47, %48 : vector<8x128xf32>
    %50 = vector.extract_strided_slice %43 {offsets = [8, 0], sizes = [8, 128], strides = [1, 1]} : vector<32x128xf32> to vector<8x128xf32>
    %51 = arith.negf %50 : vector<8x128xf32>
    %52 = math.exp %51 : vector<8x128xf32>
    %cst_20 = arith.constant 1.000000e+00 : f32
    %53 = vector.broadcast %cst_20 : f32 to vector<8x128xf32>
    %54 = arith.addf %53, %52 : vector<8x128xf32>
    %55 = arith.divf %53, %54 : vector<8x128xf32>
    %56 = vector.extract_strided_slice %43 {offsets = [16, 0], sizes = [8, 128], strides = [1, 1]} : vector<32x128xf32> to vector<8x128xf32>
    %57 = math.tanh %56 : vector<8x128xf32>
    %58 = vector.extract_strided_slice %43 {offsets = [24, 0], sizes = [8, 128], strides = [1, 1]} : vector<32x128xf32> to vector<8x128xf32>
    %59 = arith.negf %58 : vector<8x128xf32>
    %60 = math.exp %59 : vector<8x128xf32>
    %cst_21 = arith.constant 1.000000e+00 : f32
    %61 = vector.broadcast %cst_21 : f32 to vector<8x128xf32>
    %62 = arith.addf %61, %60 : vector<8x128xf32>
    %63 = arith.divf %61, %62 : vector<8x128xf32>
    %c0_22 = arith.constant 0 : index
    %c0_23 = arith.constant 0 : index
    %64 = vector.load %arg9[%c0_22, %c0_23] : memref<8x128xf32, #tpu.memory_space<vmem>>, vector<8x128xf32>
    %65 = arith.mulf %55, %64 : vector<8x128xf32>
    %66 = arith.mulf %49, %57 : vector<8x128xf32>
    %67 = arith.addf %65, %66 : vector<8x128xf32>
    %68 = math.tanh %67 : vector<8x128xf32>
    %69 = arith.mulf %63, %68 : vector<8x128xf32>
    %c0_24 = arith.constant 0 : index
    %c0_25 = arith.constant 0 : index
    %70 = vector.load %arg9[%c0_24, %c0_25] : memref<8x128xf32, #tpu.memory_space<vmem>>, vector<8x128xf32>
    tpu.vector_store %arg9[%c0_24, %c0_25], %67 {strides = array<i32>} : memref<8x128xf32, #tpu.memory_space<vmem>>, vector<8x128xf32>,
    %c0_26 = arith.constant 0 : index
    %c0_27 = arith.constant 0 : index
    %71 = vector.load %arg8[%c0_26, %c0_27] : memref<8x128xf32, #tpu.memory_space<vmem>>, vector<8x128xf32>
    tpu.vector_store %arg8[%c0_26, %c0_27], %69 {strides = array<i32>} : memref<8x128xf32, #tpu.memory_space<vmem>>, vector<8x128xf32>,
    %c0_28 = arith.constant 0 : index
    %c0_29 = arith.constant 0 : index
    %c0_30 = arith.constant 0 : index
    %72 = vector.load %arg7[%c0_28, %c0_29, %c0_30] : memref<4x8x128xf32, #tpu.memory_space<vmem>>, vector<1x8x128xf32>
    %73 = vector.shape_cast %72 : vector<1x8x128xf32> to vector<8x128xf32>
    %74 = vector.shape_cast %69 : vector<8x128xf32> to vector<1x8x128xf32>
    tpu.vector_store %arg7[%c0_28, %c0_29, %c0_30], %74 {strides = array<i32>} : memref<4x8x128xf32, #tpu.memory_space<vmem>>, vector<1x8x128xf32>,
    %c1_31 = arith.constant 1 : index
    %c0_32 = arith.constant 0 : index
    %c0_33 = arith.constant 0 : index
    %75 = vector.load %arg1[%c1_31, %c0_32, %c0_33] : memref<4x40x128xf32, #tpu.memory_space<vmem>>, vector<1x40x128xf32>
    %76 = vector.shape_cast %75 : vector<1x40x128xf32> to vector<40x128xf32>
    %cst_34 = arith.constant dense<0.000000e+00> : vector<32x128xf32>
    %77 = tpu.matmul %3, %76, %cst_34 {dimension_numbers = #tpu.dot_dimension_numbers<[1], [0], [0], [1], [0, 0, 1, 1], [], []>} : vector<32x40xf32>, vector<40x128xf32>, vector<32x128xf32> -> vector<32x128xf32>
    %c0_35 = arith.constant 0 : index
    %c0_36 = arith.constant 0 : index
    %78 = vector.load %arg8[%c0_35, %c0_36] : memref<8x128xf32, #tpu.memory_space<vmem>>, vector<8x128xf32>
    %c9_i32_37 = arith.constant 9 : i32
    %79 = tpu.dynamic_rotate %78 by %c9_i32_37 dim 1 : vector<8x128xf32>, i32 -> vector<8x128xf32>
    %80 = vector.broadcast %5 : vector<1x128xf32> to vector<8x128xf32>
    %81 = arith.mulf %79, %80 : vector<8x128xf32>
    %c8_i32_38 = arith.constant 8 : i32
    %82 = tpu.dynamic_rotate %78 by %c8_i32_38 dim 1 : vector<8x128xf32>, i32 -> vector<8x128xf32>
    %83 = vector.broadcast %6 : vector<1x128xf32> to vector<8x128xf32>
    %84 = arith.mulf %82, %83 : vector<8x128xf32>
    %c7_i32_39 = arith.constant 7 : i32
    %85 = tpu.dynamic_rotate %78 by %c7_i32_39 dim 1 : vector<8x128xf32>, i32 -> vector<8x128xf32>
    %86 = vector.broadcast %7 : vector<1x128xf32> to vector<8x128xf32>
    %87 = arith.mulf %85, %86 : vector<8x128xf32>
    %c1_i32_40 = arith.constant 1 : i32
    %88 = tpu.dynamic_rotate %78 by %c1_i32_40 dim 1 : vector<8x128xf32>, i32 -> vector<8x128xf32>
    %89 = vector.broadcast %8 : vector<1x128xf32> to vector<8x128xf32>
    %90 = arith.mulf %88, %89 : vector<8x128xf32>
    %c127_i32_41 = arith.constant 127 : i32
    %91 = tpu.dynamic_rotate %78 by %c127_i32_41 dim 1 : vector<8x128xf32>, i32 -> vector<8x128xf32>
    %92 = vector.broadcast %9 : vector<1x128xf32> to vector<8x128xf32>
    %93 = arith.mulf %91, %92 : vector<8x128xf32>
    %c121_i32_42 = arith.constant 121 : i32
    %94 = tpu.dynamic_rotate %78 by %c121_i32_42 dim 1 : vector<8x128xf32>, i32 -> vector<8x128xf32>
    %95 = vector.broadcast %10 : vector<1x128xf32> to vector<8x128xf32>
    %96 = arith.mulf %94, %95 : vector<8x128xf32>
    %c120_i32_43 = arith.constant 120 : i32
    %97 = tpu.dynamic_rotate %78 by %c120_i32_43 dim 1 : vector<8x128xf32>, i32 -> vector<8x128xf32>
    %98 = vector.broadcast %11 : vector<1x128xf32> to vector<8x128xf32>
    %99 = arith.mulf %97, %98 : vector<8x128xf32>
    %c119_i32_44 = arith.constant 119 : i32
    %100 = tpu.dynamic_rotate %78 by %c119_i32_44 dim 1 : vector<8x128xf32>, i32 -> vector<8x128xf32>
    %101 = vector.broadcast %12 : vector<1x128xf32> to vector<8x128xf32>
    %102 = arith.mulf %100, %101 : vector<8x128xf32>
    %103 = tpu.concatenate %81, %84, %87, %90, %78, %93, %96, %99, %102 in 0 : vector<8x128xf32>, vector<8x128xf32>, vector<8x128xf32>, vector<8x128xf32>, vector<8x128xf32>, vector<8x128xf32>, vector<8x128xf32>, vector<8x128xf32>, vector<8x128xf32> -> vector<72x128xf32>
    %cst_45 = arith.constant dense<0.000000e+00> : vector<32x128xf32>
    %104 = tpu.matmul %4, %103, %cst_45 {dimension_numbers = #tpu.dot_dimension_numbers<[1], [0], [0], [1], [0, 0, 1, 1], [], []>} : vector<32x72xf32>, vector<72x128xf32>, vector<32x128xf32> -> vector<32x128xf32>
    %105 = arith.addf %77, %104 : vector<32x128xf32>
    %106 = vector.extract_strided_slice %105 {offsets = [0, 0], sizes = [8, 128], strides = [1, 1]} : vector<32x128xf32> to vector<8x128xf32>
    %107 = arith.negf %106 : vector<8x128xf32>
    %108 = math.exp %107 : vector<8x128xf32>
    %cst_46 = arith.constant 1.000000e+00 : f32
    %109 = vector.broadcast %cst_46 : f32 to vector<8x128xf32>
    %110 = arith.addf %109, %108 : vector<8x128xf32>
    %111 = arith.divf %109, %110 : vector<8x128xf32>
    %112 = vector.extract_strided_slice %105 {offsets = [8, 0], sizes = [8, 128], strides = [1, 1]} : vector<32x128xf32> to vector<8x128xf32>
    %113 = arith.negf %112 : vector<8x128xf32>
    %114 = math.exp %113 : vector<8x128xf32>
    %cst_47 = arith.constant 1.000000e+00 : f32
    %115 = vector.broadcast %cst_47 : f32 to vector<8x128xf32>
    %116 = arith.addf %115, %114 : vector<8x128xf32>
    %117 = arith.divf %115, %116 : vector<8x128xf32>
    %118 = vector.extract_strided_slice %105 {offsets = [16, 0], sizes = [8, 128], strides = [1, 1]} : vector<32x128xf32> to vector<8x128xf32>
    %119 = math.tanh %118 : vector<8x128xf32>
    %120 = vector.extract_strided_slice %105 {offsets = [24, 0], sizes = [8, 128], strides = [1, 1]} : vector<32x128xf32> to vector<8x128xf32>
    %121 = arith.negf %120 : vector<8x128xf32>
    %122 = math.exp %121 : vector<8x128xf32>
    %cst_48 = arith.constant 1.000000e+00 : f32
    %123 = vector.broadcast %cst_48 : f32 to vector<8x128xf32>
    %124 = arith.addf %123, %122 : vector<8x128xf32>
    %125 = arith.divf %123, %124 : vector<8x128xf32>
    %c0_49 = arith.constant 0 : index
    %c0_50 = arith.constant 0 : index
    %126 = vector.load %arg9[%c0_49, %c0_50] : memref<8x128xf32, #tpu.memory_space<vmem>>, vector<8x128xf32>
    %127 = arith.mulf %117, %126 : vector<8x128xf32>
    %128 = arith.mulf %111, %119 : vector<8x128xf32>
    %129 = arith.addf %127, %128 : vector<8x128xf32>
    %130 = math.tanh %129 : vector<8x128xf32>
    %131 = arith.mulf %125, %130 : vector<8x128xf32>
    %c0_51 = arith.constant 0 : index
    %c0_52 = arith.constant 0 : index
    %132 = vector.load %arg9[%c0_51, %c0_52] : memref<8x128xf32, #tpu.memory_space<vmem>>, vector<8x128xf32>
    tpu.vector_store %arg9[%c0_51, %c0_52], %129 {strides = array<i32>} : memref<8x128xf32, #tpu.memory_space<vmem>>, vector<8x128xf32>,
    %c0_53 = arith.constant 0 : index
    %c0_54 = arith.constant 0 : index
    %133 = vector.load %arg8[%c0_53, %c0_54] : memref<8x128xf32, #tpu.memory_space<vmem>>, vector<8x128xf32>
    tpu.vector_store %arg8[%c0_53, %c0_54], %131 {strides = array<i32>} : memref<8x128xf32, #tpu.memory_space<vmem>>, vector<8x128xf32>,
    %c1_55 = arith.constant 1 : index
    %c0_56 = arith.constant 0 : index
    %c0_57 = arith.constant 0 : index
    %134 = vector.load %arg7[%c1_55, %c0_56, %c0_57] : memref<4x8x128xf32, #tpu.memory_space<vmem>>, vector<1x8x128xf32>
    %135 = vector.shape_cast %134 : vector<1x8x128xf32> to vector<8x128xf32>
    %136 = vector.shape_cast %131 : vector<8x128xf32> to vector<1x8x128xf32>
    tpu.vector_store %arg7[%c1_55, %c0_56, %c0_57], %136 {strides = array<i32>} : memref<4x8x128xf32, #tpu.memory_space<vmem>>, vector<1x8x128xf32>,
    %c2_58 = arith.constant 2 : index
    %c0_59 = arith.constant 0 : index
    %c0_60 = arith.constant 0 : index
    %137 = vector.load %arg1[%c2_58, %c0_59, %c0_60] : memref<4x40x128xf32, #tpu.memory_space<vmem>>, vector<1x40x128xf32>
    %138 = vector.shape_cast %137 : vector<1x40x128xf32> to vector<40x128xf32>
    %cst_61 = arith.constant dense<0.000000e+00> : vector<32x128xf32>
    %139 = tpu.matmul %3, %138, %cst_61 {dimension_numbers = #tpu.dot_dimension_numbers<[1], [0], [0], [1], [0, 0, 1, 1], [], []>} : vector<32x40xf32>, vector<40x128xf32>, vector<32x128xf32> -> vector<32x128xf32>
    %c0_62 = arith.constant 0 : index
    %c0_63 = arith.constant 0 : index
    %140 = vector.load %arg8[%c0_62, %c0_63] : memref<8x128xf32, #tpu.memory_space<vmem>>, vector<8x128xf32>
    %c9_i32_64 = arith.constant 9 : i32
    %141 = tpu.dynamic_rotate %140 by %c9_i32_64 dim 1 : vector<8x128xf32>, i32 -> vector<8x128xf32>
    %142 = vector.broadcast %5 : vector<1x128xf32> to vector<8x128xf32>
    %143 = arith.mulf %141, %142 : vector<8x128xf32>
    %c8_i32_65 = arith.constant 8 : i32
    %144 = tpu.dynamic_rotate %140 by %c8_i32_65 dim 1 : vector<8x128xf32>, i32 -> vector<8x128xf32>
    %145 = vector.broadcast %6 : vector<1x128xf32> to vector<8x128xf32>
    %146 = arith.mulf %144, %145 : vector<8x128xf32>
    %c7_i32_66 = arith.constant 7 : i32
    %147 = tpu.dynamic_rotate %140 by %c7_i32_66 dim 1 : vector<8x128xf32>, i32 -> vector<8x128xf32>
    %148 = vector.broadcast %7 : vector<1x128xf32> to vector<8x128xf32>
    %149 = arith.mulf %147, %148 : vector<8x128xf32>
    %c1_i32_67 = arith.constant 1 : i32
    %150 = tpu.dynamic_rotate %140 by %c1_i32_67 dim 1 : vector<8x128xf32>, i32 -> vector<8x128xf32>
    %151 = vector.broadcast %8 : vector<1x128xf32> to vector<8x128xf32>
    %152 = arith.mulf %150, %151 : vector<8x128xf32>
    %c127_i32_68 = arith.constant 127 : i32
    %153 = tpu.dynamic_rotate %140 by %c127_i32_68 dim 1 : vector<8x128xf32>, i32 -> vector<8x128xf32>
    %154 = vector.broadcast %9 : vector<1x128xf32> to vector<8x128xf32>
    %155 = arith.mulf %153, %154 : vector<8x128xf32>
    %c121_i32_69 = arith.constant 121 : i32
    %156 = tpu.dynamic_rotate %140 by %c121_i32_69 dim 1 : vector<8x128xf32>, i32 -> vector<8x128xf32>
    %157 = vector.broadcast %10 : vector<1x128xf32> to vector<8x128xf32>
    %158 = arith.mulf %156, %157 : vector<8x128xf32>
    %c120_i32_70 = arith.constant 120 : i32
    %159 = tpu.dynamic_rotate %140 by %c120_i32_70 dim 1 : vector<8x128xf32>, i32 -> vector<8x128xf32>
    %160 = vector.broadcast %11 : vector<1x128xf32> to vector<8x128xf32>
    %161 = arith.mulf %159, %160 : vector<8x128xf32>
    %c119_i32_71 = arith.constant 119 : i32
    %162 = tpu.dynamic_rotate %140 by %c119_i32_71 dim 1 : vector<8x128xf32>, i32 -> vector<8x128xf32>
    %163 = vector.broadcast %12 : vector<1x128xf32> to vector<8x128xf32>
    %164 = arith.mulf %162, %163 : vector<8x128xf32>
    %165 = tpu.concatenate %143, %146, %149, %152, %140, %155, %158, %161, %164 in 0 : vector<8x128xf32>, vector<8x128xf32>, vector<8x128xf32>, vector<8x128xf32>, vector<8x128xf32>, vector<8x128xf32>, vector<8x128xf32>, vector<8x128xf32>, vector<8x128xf32> -> vector<72x128xf32>
    %cst_72 = arith.constant dense<0.000000e+00> : vector<32x128xf32>
    %166 = tpu.matmul %4, %165, %cst_72 {dimension_numbers = #tpu.dot_dimension_numbers<[1], [0], [0], [1], [0, 0, 1, 1], [], []>} : vector<32x72xf32>, vector<72x128xf32>, vector<32x128xf32> -> vector<32x128xf32>
    %167 = arith.addf %139, %166 : vector<32x128xf32>
    %168 = vector.extract_strided_slice %167 {offsets = [0, 0], sizes = [8, 128], strides = [1, 1]} : vector<32x128xf32> to vector<8x128xf32>
    %169 = arith.negf %168 : vector<8x128xf32>
    %170 = math.exp %169 : vector<8x128xf32>
    %cst_73 = arith.constant 1.000000e+00 : f32
    %171 = vector.broadcast %cst_73 : f32 to vector<8x128xf32>
    %172 = arith.addf %171, %170 : vector<8x128xf32>
    %173 = arith.divf %171, %172 : vector<8x128xf32>
    %174 = vector.extract_strided_slice %167 {offsets = [8, 0], sizes = [8, 128], strides = [1, 1]} : vector<32x128xf32> to vector<8x128xf32>
    %175 = arith.negf %174 : vector<8x128xf32>
    %176 = math.exp %175 : vector<8x128xf32>
    %cst_74 = arith.constant 1.000000e+00 : f32
    %177 = vector.broadcast %cst_74 : f32 to vector<8x128xf32>
    %178 = arith.addf %177, %176 : vector<8x128xf32>
    %179 = arith.divf %177, %178 : vector<8x128xf32>
    %180 = vector.extract_strided_slice %167 {offsets = [16, 0], sizes = [8, 128], strides = [1, 1]} : vector<32x128xf32> to vector<8x128xf32>
    %181 = math.tanh %180 : vector<8x128xf32>
    %182 = vector.extract_strided_slice %167 {offsets = [24, 0], sizes = [8, 128], strides = [1, 1]} : vector<32x128xf32> to vector<8x128xf32>
    %183 = arith.negf %182 : vector<8x128xf32>
    %184 = math.exp %183 : vector<8x128xf32>
    %cst_75 = arith.constant 1.000000e+00 : f32
    %185 = vector.broadcast %cst_75 : f32 to vector<8x128xf32>
    %186 = arith.addf %185, %184 : vector<8x128xf32>
    %187 = arith.divf %185, %186 : vector<8x128xf32>
    %c0_76 = arith.constant 0 : index
    %c0_77 = arith.constant 0 : index
    %188 = vector.load %arg9[%c0_76, %c0_77] : memref<8x128xf32, #tpu.memory_space<vmem>>, vector<8x128xf32>
    %189 = arith.mulf %179, %188 : vector<8x128xf32>
    %190 = arith.mulf %173, %181 : vector<8x128xf32>
    %191 = arith.addf %189, %190 : vector<8x128xf32>
    %192 = math.tanh %191 : vector<8x128xf32>
    %193 = arith.mulf %187, %192 : vector<8x128xf32>
    %c0_78 = arith.constant 0 : index
    %c0_79 = arith.constant 0 : index
    %194 = vector.load %arg9[%c0_78, %c0_79] : memref<8x128xf32, #tpu.memory_space<vmem>>, vector<8x128xf32>
    tpu.vector_store %arg9[%c0_78, %c0_79], %191 {strides = array<i32>} : memref<8x128xf32, #tpu.memory_space<vmem>>, vector<8x128xf32>,
    %c0_80 = arith.constant 0 : index
    %c0_81 = arith.constant 0 : index
    %195 = vector.load %arg8[%c0_80, %c0_81] : memref<8x128xf32, #tpu.memory_space<vmem>>, vector<8x128xf32>
    tpu.vector_store %arg8[%c0_80, %c0_81], %193 {strides = array<i32>} : memref<8x128xf32, #tpu.memory_space<vmem>>, vector<8x128xf32>,
    %c2_82 = arith.constant 2 : index
    %c0_83 = arith.constant 0 : index
    %c0_84 = arith.constant 0 : index
    %196 = vector.load %arg7[%c2_82, %c0_83, %c0_84] : memref<4x8x128xf32, #tpu.memory_space<vmem>>, vector<1x8x128xf32>
    %197 = vector.shape_cast %196 : vector<1x8x128xf32> to vector<8x128xf32>
    %198 = vector.shape_cast %193 : vector<8x128xf32> to vector<1x8x128xf32>
    tpu.vector_store %arg7[%c2_82, %c0_83, %c0_84], %198 {strides = array<i32>} : memref<4x8x128xf32, #tpu.memory_space<vmem>>, vector<1x8x128xf32>,
    %c3_85 = arith.constant 3 : index
    %c0_86 = arith.constant 0 : index
    %c0_87 = arith.constant 0 : index
    %199 = vector.load %arg1[%c3_85, %c0_86, %c0_87] : memref<4x40x128xf32, #tpu.memory_space<vmem>>, vector<1x40x128xf32>
    %200 = vector.shape_cast %199 : vector<1x40x128xf32> to vector<40x128xf32>
    %cst_88 = arith.constant dense<0.000000e+00> : vector<32x128xf32>
    %201 = tpu.matmul %3, %200, %cst_88 {dimension_numbers = #tpu.dot_dimension_numbers<[1], [0], [0], [1], [0, 0, 1, 1], [], []>} : vector<32x40xf32>, vector<40x128xf32>, vector<32x128xf32> -> vector<32x128xf32>
    %c0_89 = arith.constant 0 : index
    %c0_90 = arith.constant 0 : index
    %202 = vector.load %arg8[%c0_89, %c0_90] : memref<8x128xf32, #tpu.memory_space<vmem>>, vector<8x128xf32>
    %c9_i32_91 = arith.constant 9 : i32
    %203 = tpu.dynamic_rotate %202 by %c9_i32_91 dim 1 : vector<8x128xf32>, i32 -> vector<8x128xf32>
    %204 = vector.broadcast %5 : vector<1x128xf32> to vector<8x128xf32>
    %205 = arith.mulf %203, %204 : vector<8x128xf32>
    %c8_i32_92 = arith.constant 8 : i32
    %206 = tpu.dynamic_rotate %202 by %c8_i32_92 dim 1 : vector<8x128xf32>, i32 -> vector<8x128xf32>
    %207 = vector.broadcast %6 : vector<1x128xf32> to vector<8x128xf32>
    %208 = arith.mulf %206, %207 : vector<8x128xf32>
    %c7_i32_93 = arith.constant 7 : i32
    %209 = tpu.dynamic_rotate %202 by %c7_i32_93 dim 1 : vector<8x128xf32>, i32 -> vector<8x128xf32>
    %210 = vector.broadcast %7 : vector<1x128xf32> to vector<8x128xf32>
    %211 = arith.mulf %209, %210 : vector<8x128xf32>
    %c1_i32_94 = arith.constant 1 : i32
    %212 = tpu.dynamic_rotate %202 by %c1_i32_94 dim 1 : vector<8x128xf32>, i32 -> vector<8x128xf32>
    %213 = vector.broadcast %8 : vector<1x128xf32> to vector<8x128xf32>
    %214 = arith.mulf %212, %213 : vector<8x128xf32>
    %c127_i32_95 = arith.constant 127 : i32
    %215 = tpu.dynamic_rotate %202 by %c127_i32_95 dim 1 : vector<8x128xf32>, i32 -> vector<8x128xf32>
    %216 = vector.broadcast %9 : vector<1x128xf32> to vector<8x128xf32>
    %217 = arith.mulf %215, %216 : vector<8x128xf32>
    %c121_i32_96 = arith.constant 121 : i32
    %218 = tpu.dynamic_rotate %202 by %c121_i32_96 dim 1 : vector<8x128xf32>, i32 -> vector<8x128xf32>
    %219 = vector.broadcast %10 : vector<1x128xf32> to vector<8x128xf32>
    %220 = arith.mulf %218, %219 : vector<8x128xf32>
    %c120_i32_97 = arith.constant 120 : i32
    %221 = tpu.dynamic_rotate %202 by %c120_i32_97 dim 1 : vector<8x128xf32>, i32 -> vector<8x128xf32>
    %222 = vector.broadcast %11 : vector<1x128xf32> to vector<8x128xf32>
    %223 = arith.mulf %221, %222 : vector<8x128xf32>
    %c119_i32_98 = arith.constant 119 : i32
    %224 = tpu.dynamic_rotate %202 by %c119_i32_98 dim 1 : vector<8x128xf32>, i32 -> vector<8x128xf32>
    %225 = vector.broadcast %12 : vector<1x128xf32> to vector<8x128xf32>
    %226 = arith.mulf %224, %225 : vector<8x128xf32>
    %227 = tpu.concatenate %205, %208, %211, %214, %202, %217, %220, %223, %226 in 0 : vector<8x128xf32>, vector<8x128xf32>, vector<8x128xf32>, vector<8x128xf32>, vector<8x128xf32>, vector<8x128xf32>, vector<8x128xf32>, vector<8x128xf32>, vector<8x128xf32> -> vector<72x128xf32>
    %cst_99 = arith.constant dense<0.000000e+00> : vector<32x128xf32>
    %228 = tpu.matmul %4, %227, %cst_99 {dimension_numbers = #tpu.dot_dimension_numbers<[1], [0], [0], [1], [0, 0, 1, 1], [], []>} : vector<32x72xf32>, vector<72x128xf32>, vector<32x128xf32> -> vector<32x128xf32>
    %229 = arith.addf %201, %228 : vector<32x128xf32>
    %230 = vector.extract_strided_slice %229 {offsets = [0, 0], sizes = [8, 128], strides = [1, 1]} : vector<32x128xf32> to vector<8x128xf32>
    %231 = arith.negf %230 : vector<8x128xf32>
    %232 = math.exp %231 : vector<8x128xf32>
    %cst_100 = arith.constant 1.000000e+00 : f32
    %233 = vector.broadcast %cst_100 : f32 to vector<8x128xf32>
    %234 = arith.addf %233, %232 : vector<8x128xf32>
    %235 = arith.divf %233, %234 : vector<8x128xf32>
    %236 = vector.extract_strided_slice %229 {offsets = [8, 0], sizes = [8, 128], strides = [1, 1]} : vector<32x128xf32> to vector<8x128xf32>
    %237 = arith.negf %236 : vector<8x128xf32>
    %238 = math.exp %237 : vector<8x128xf32>
    %cst_101 = arith.constant 1.000000e+00 : f32
    %239 = vector.broadcast %cst_101 : f32 to vector<8x128xf32>
    %240 = arith.addf %239, %238 : vector<8x128xf32>
    %241 = arith.divf %239, %240 : vector<8x128xf32>
    %242 = vector.extract_strided_slice %229 {offsets = [16, 0], sizes = [8, 128], strides = [1, 1]} : vector<32x128xf32> to vector<8x128xf32>
    %243 = math.tanh %242 : vector<8x128xf32>
    %244 = vector.extract_strided_slice %229 {offsets = [24, 0], sizes = [8, 128], strides = [1, 1]} : vector<32x128xf32> to vector<8x128xf32>
    %245 = arith.negf %244 : vector<8x128xf32>
    %246 = math.exp %245 : vector<8x128xf32>
    %cst_102 = arith.constant 1.000000e+00 : f32
    %247 = vector.broadcast %cst_102 : f32 to vector<8x128xf32>
    %248 = arith.addf %247, %246 : vector<8x128xf32>
    %249 = arith.divf %247, %248 : vector<8x128xf32>
    %c0_103 = arith.constant 0 : index
    %c0_104 = arith.constant 0 : index
    %250 = vector.load %arg9[%c0_103, %c0_104] : memref<8x128xf32, #tpu.memory_space<vmem>>, vector<8x128xf32>
    %251 = arith.mulf %241, %250 : vector<8x128xf32>
    %252 = arith.mulf %235, %243 : vector<8x128xf32>
    %253 = arith.addf %251, %252 : vector<8x128xf32>
    %254 = math.tanh %253 : vector<8x128xf32>
    %255 = arith.mulf %249, %254 : vector<8x128xf32>
    %c0_105 = arith.constant 0 : index
    %c0_106 = arith.constant 0 : index
    %256 = vector.load %arg9[%c0_105, %c0_106] : memref<8x128xf32, #tpu.memory_space<vmem>>, vector<8x128xf32>
    tpu.vector_store %arg9[%c0_105, %c0_106], %253 {strides = array<i32>} : memref<8x128xf32, #tpu.memory_space<vmem>>, vector<8x128xf32>,
    %c0_107 = arith.constant 0 : index
    %c0_108 = arith.constant 0 : index
    %257 = vector.load %arg8[%c0_107, %c0_108] : memref<8x128xf32, #tpu.memory_space<vmem>>, vector<8x128xf32>
    tpu.vector_store %arg8[%c0_107, %c0_108], %255 {strides = array<i32>} : memref<8x128xf32, #tpu.memory_space<vmem>>, vector<8x128xf32>,
    %c3_109 = arith.constant 3 : index
    %c0_110 = arith.constant 0 : index
    %c0_111 = arith.constant 0 : index
    %258 = vector.load %arg7[%c3_109, %c0_110, %c0_111] : memref<4x8x128xf32, #tpu.memory_space<vmem>>, vector<1x8x128xf32>
    %259 = vector.shape_cast %258 : vector<1x8x128xf32> to vector<8x128xf32>
    %260 = vector.shape_cast %255 : vector<8x128xf32> to vector<1x8x128xf32>
    tpu.vector_store %arg7[%c3_109, %c0_110, %c0_111], %260 {strides = array<i32>} : memref<4x8x128xf32, #tpu.memory_space<vmem>>, vector<1x8x128xf32>,
    return
  }
  func.func @transform_0(%arg0: i32) -> (i32, i32, i32) {
    %c0_i32 = arith.constant 0 : i32
    %c0_i32_0 = arith.constant 0 : i32
    %c0_i32_1 = arith.constant 0 : i32
    return %arg0, %c0_i32, %c0_i32_0 : i32, i32, i32
  }
  func.func @transform_1(%arg0: i32) -> (i32, i32) {
    %c0_i32 = arith.constant 0 : i32
    %c0_i32_0 = arith.constant 0 : i32
    %c0_i32_1 = arith.constant 0 : i32
    return %c0_i32, %c0_i32_0 : i32, i32
  }
  func.func @transform_2(%arg0: i32) -> (i32, i32) {
    %c0_i32 = arith.constant 0 : i32
    %c0_i32_0 = arith.constant 0 : i32
    %c0_i32_1 = arith.constant 0 : i32
    return %c0_i32, %c0_i32_0 : i32, i32
  }
  func.func @transform_3(%arg0: i32) -> (i32, i32) {
    %c0_i32 = arith.constant 0 : i32
    %c0_i32_0 = arith.constant 0 : i32
    %c0_i32_1 = arith.constant 0 : i32
    return %c0_i32, %c0_i32_0 : i32, i32
  }
  func.func @transform_4(%arg0: i32) -> (i32, i32) {
    %c0_i32 = arith.constant 0 : i32
    %c0_i32_0 = arith.constant 0 : i32
    %c0_i32_1 = arith.constant 0 : i32
    return %c0_i32, %c0_i32_0 : i32, i32
  }
  func.func @transform_5(%arg0: i32) -> (i32, i32) {
    %c0_i32 = arith.constant 0 : i32
    %c0_i32_0 = arith.constant 0 : i32
    %c0_i32_1 = arith.constant 0 : i32
    return %c0_i32, %c0_i32_0 : i32, i32
  }
  func.func @transform_6(%arg0: i32) -> (i32, i32, i32) {
    %c0_i32 = arith.constant 0 : i32
    %c0_i32_0 = arith.constant 0 : i32
    %c0_i32_1 = arith.constant 0 : i32
    return %arg0, %c0_i32, %c0_i32_0 : i32, i32, i32
  }
}

</mosaic_0001>

<bundles_post_ra>
// kernel: tpu_custom_call.1
= control target key start
LH: loop header
LB: loop body
LE: loop exit
PB: predicated region body
PF: predicated region fallthrough
CT: control target
= control target key end

     0   :  { %11 = vsyncpa [#allocation5], 0  ;;  %s2659_s0 = inlined_call_operand.hbm [shape: f32[8,40,128], index: 0, kind: input, shape index: {}]   ;;  %s2660_s1 = inlined_call_operand.hbm [shape: f32[32,40], index: 1, kind: input, shape index: {}]   ;;  %s2661_s2 = inlined_call_operand.hbm [shape: f32[32,72], index: 2, kind: input, shape index: {}]   ;;  %s2662_s3 = inlined_call_operand.hbm [shape: f32[9,128], index: 3, kind: input, shape index: {}]   ;;  %s2663_s4 = inlined_call_operand.hbm [shape: f32[8,128], index: 4, kind: input, shape index: {}]   ;;  %s2664_s5 = inlined_call_operand.vmem [shape: f32[8,128], index: 5, kind: input, shape index: {}]   ;;  %s2665_s6 = inlined_call_operand.hbm [shape: f32[8,8,128], index: 6, kind: output, shape index: {}]  }
   0x1   :  { %13 = vsyncpa [#allocation5 + $0x1], 0 }
   0x2   :  { %14 = vsyncpa [#allocation8], 0 }
   0x3   :  { %15 = vsyncpa [#allocation11], 0 }
   0x4   :  { %16 = vsyncpa [#allocation6], 0 }
   0x5   :  { %18 = vsyncpa [#allocation6 + $0x1], 0  ;;  %s2218_s21 = smov 0   ;;  %s2220_s22 = smov 0  }
   0x6   :  { %s2222_s23 = smov 0   ;;  %s2224_s24 = smov 0  }
   0x7 LB: > { %s2239_s25 = sadd.s32 4294967295, %s2164_s24   ;;  %s1454_s26 = sadd.s32 4294967294, %s2164_s24   ;;  %s2164_s24 = sphi %s2224_s24, %s2693_s24   ;;  %s2160_s23 = sphi %s2222_s23, %s2692_s23   ;;  %s2156_s22 = sphi %s2220_s22, %s2691_s22   ;;  %s2152_s21 = sphi %s2218_s21, %s2690_s21  }
   0x8   : > { %p44_p0 = scmp.ne.s32.totalorder %s2156_s22, %s2152_s21  ;;  %p2666_p1 = scmp.eq.s32.totalorder %s2239_s25, 0 }
   0x9   : > { %p173_p2 = scmp.eq.s32.totalorder %s2239_s25, 1  ;;  %p179_p3 = scmp.eq.s32.totalorder %s1454_s26, 1 }
   0xa   : > { %p2248_p4 = por %p2666_p1, %p44_p0  ;;  %p1455_p5 = scmp.ge.s32.totalorder %s2164_s24, 1 }
   0xb   : > { %p2253_p6 = por %p179_p3, %p44_p0  ;;  %p186_p7 = scmp.lt.s32.totalorder %s2164_s24, 3 }
   0xc   : > { %s2672_s27 = scalar_select %p2248_p4, 1, 0 }
   0xd   : > { %s2673_s28 = scalar_select %p2253_p6, 1, 0 }
   0xe   : > { %p2259_p9 = pnand %p1455_p5, %p186_p7  ;;  %s2166_s30 = smov [#allocation7]  }
   0xf   : > { %s198_s7 = sshll.u32 %s2166_s30, 4  ;;  %s2167_s9 = smov [#allocation10]   ;;  %s199_s7 = int_to_ptr.vmem [resolvable:$true] %s198_s7 }
  0x10   : > { %s2674_s29 = scalar_select %p2259_p9, 1, 0 }
  0x11   : > { %p1818_p10 = pneg %p2259_p9  ;;  %s224_s10 = sshll.u32 %s2167_s9, 4  ;;  %s225_s10 = int_to_ptr.vmem [resolvable:$true] %s224_s10 }
  0x12   : > { %s2168_s11 = smov [#allocation9]   ;;  %s1971_s13 = scalar_lea.vmem %s199_s7, 512 }
  0x13   : > { %p2268_p12 = pnand %p1818_p10, %p2666_p1  ;;  %s211_s12 = sshll.u32 %s2168_s11, 4  ;;  %s212_s12 = int_to_ptr.vmem [resolvable:$true] %s211_s12 }
  0x14   : > { %p1972_p0 = scmp.ne.s32.totalorder %s199_s7, %s1971_s13  ;;  %p1979_p7 = scmp.lt.s32.totalorder %s199_s7, %s199_s7 }
  0x15   : > { %p1962_p13 = pneg %p2268_p12  ;;  %p1980_p10 = scmp.lt.s32.totalorder %s1971_s13, %s1971_s13 }
  0x17   : > { %p1974_p3 = pnand %p1972_p0, %p1962_p13  ;;  %p1981_p11 = por %p1980_p10, %p1979_p7 }
  0x19   : > { %p1975_p5 = pneg %p1974_p3 }
  0x1b   : > { %p1982_p8 = pnand %p1981_p11, %p1975_p5 }
  0x1d   : > { %1985 = shalt.err (!%p1982_p8)
}
  0x1e   : > { %s2667_s14 = smov 128   ;;  %s2668_s15 = smov 8  }
  0x1f   : > { %1821 = dma.hbm_to_vmem [thread:$0]  (!%p2268_p12), %s2660_s1, 512, %s199_s7, [#allocation8], %s2667_s14, %s2667_s14, %s2668_s15  }
  0x20   : > { %s1997_s18 = scalar_lea.vmem %s225_s10, 256  ;;  %p2005_p11 = scmp.lt.s32.totalorder %s225_s10, %s225_s10 }
  0x21   : > { %p1998_p0 = scmp.ne.s32.totalorder %s225_s10, %s1997_s18  ;;  %p2006_p8 = scmp.lt.s32.totalorder %s1997_s18, %s1997_s18 }
  0x23   : > { %p2000_p3 = pnand %p1998_p0, %p1962_p13  ;;  %p2007_p5 = por %p2006_p8, %p2005_p11 }
  0x25   : > { %p2001_p7 = pneg %p2000_p3 }
  0x27   : > { %p2008_p10 = pnand %p2007_p5, %p2001_p7 }
  0x29   : > { %2011 = shalt.err (!%p2008_p10)
}
  0x2a   : > { %1827 = dma.hbm_to_vmem [thread:$0]  (!%p2268_p12), %s2662_s3, 256, %s225_s10, [#allocation11], %s2667_s14, %s2667_s14, %s2668_s15  }
  0x2b   : > { %s2023_s26 = scalar_lea.vmem %s212_s12, 512  ;;  %p2031_p11 = scmp.lt.s32.totalorder %s212_s12, %s212_s12 }
  0x2c   : > { %p2024_p1 = scmp.ne.s32.totalorder %s212_s12, %s2023_s26  ;;  %p2032_p7 = scmp.lt.s32.totalorder %s2023_s26, %s2023_s26 }
  0x2e   : > { %p2026_p0 = pnand %p2024_p1, %p1962_p13  ;;  %p2033_p8 = por %p2032_p7, %p2031_p11 }
  0x30   : > { %p2027_p3 = pneg %p2026_p0 }
  0x32   : > { %p2034_p5 = pnand %p2033_p8, %p2027_p3 }
  0x34   : > { %2037 = shalt.err (!%p2034_p5)
}
  0x35   : > { %1824 = dma.hbm_to_vmem [thread:$0]  (!%p2268_p12), %s2661_s2, 512, %s212_s12, [#allocation8], %s2667_s14, %s2667_s14, %s2668_s15  }
  0x36   : > { %s2171_s9 = smov [#allocation12]  }
  0x37   : > { %s238_s10 = sshll.u32 %s2171_s9, 4  ;;  %s239_s10 = int_to_ptr.vmem [resolvable:$true] %s238_s10 }
  0x38   : > { %s2049_s11 = scalar_lea.vmem %s239_s10, 128  ;;  %p2057_p3 = scmp.lt.s32.totalorder %s239_s10, %s239_s10 }
  0x39   : > { %p2050_p1 = scmp.ne.s32.totalorder %s239_s10, %s2049_s11  ;;  %p2058_p11 = scmp.lt.s32.totalorder %s2049_s11, %s2049_s11 }
  0x3b   : > { %p2052_p10 = pnand %p2050_p1, %p1962_p13  ;;  %p2059_p7 = por %p2058_p11, %p2057_p3 }
  0x3d   : > { %p2053_p0 = pneg %p2052_p10 }
  0x3f   : > { %p2060_p8 = pnand %p2059_p7, %p2053_p0 }
  0x41   : > { %2063 = shalt.err (!%p2060_p8)
}
  0x42   : > { %1830 = dma.hbm_to_vmem [thread:$0]  (!%p2268_p12), %s2663_s4, 128, %s239_s10, [#allocation11]  }
  0x43   : > { %s2316_s12 = sadd.s32 1, %s2164_s24   ;;  %s31_s17 = sadd.s32 1, %s2160_s23 }
  0x44   : > { %s28_s8 = ssub.s32 %s2164_s24, %s2316_s12  ;;  %p38_p13 = scmp.ne.s32.totalorder %s2160_s23, %s2156_s22 }
  0x45   : > { %p29_p5 = scmp.eq.s32.totalorder %s28_s8, 0  ;;  %p39_p1 = scmp.eq.s32.totalorder %s2164_s24, 0 }
  0x46   : > { %p2326_p10 = por %p173_p2, %p38_p13  ;;  %p1843_p0 = scmp.lt.s32.totalorder %s2164_s24, 2 }
  0x47   : > { %s2332_s19 = scalar_select %p29_p5, %s2160_s23, %s31_s17  }
  0x48   : > { %s2676_s18 = scalar_select %p2326_p10, 1, 0 }
  0x49   : > { %p40_p3 = por %p39_p1, %p38_p13  ;;  %s252_s20 = sand.u32 1, %s2160_s23  }
  0x4a   : > { %s1795_s26 = smul.u32 160, %s252_s20  ;;  %s2347_s17 = scalar_lea.sflag [#allocation5], %s252_s20 }
  0x4b   : > { %s1796_s30 = smul.u32 2560, %s2164_s24  ;;  %p2336_p12 = pnand %p1843_p0, %p40_p3 }
  0x4c   : > { %s256_s13 = scalar_lea.vmem [#allocation4], %s1795_s26 }
  0x4d   : > { %s2343_s11 = scalar_lea.hbm %s2659_s0, %s1796_s30  ;;  %s264_s16 = sshll.u32 %s256_s13, 4  ;;  %s2345_s16 = int_to_ptr.vmem [resolvable:$true] %s264_s16 }
  0x4e   : > { %s2064_s8 = scalar_lea.hbm %s2343_s11, 2560  ;;  %p2066_p11 = pneg %p2336_p12 }
  0x4f   : > { %p2065_p2 = scmp.ne.s32.totalorder %s2343_s11, %s2064_s8  ;;  %s2069_s30 = scalar_lea.hbm %s2659_s0, 5120 }
  0x50   : > { %p2070_p13 = scmp.lt.s32.totalorder %s2343_s11, %s2659_s0  ;;  %p2071_p5 = scmp.lt.s32.totalorder %s2069_s30, %s2064_s8 }
  0x51   : > { %p2067_p7 = pnand %p2066_p11, %p2065_p2 }
  0x52   : > { %p2072_p1 = por %p2071_p5, %p2070_p13 }
  0x53   : > { %p2068_p8 = pneg %p2067_p7 }
  0x55   : > { %p2073_p0 = pnand %p2072_p1, %p2068_p8 }
  0x57   : > { %2076 = shalt.err (!%p2073_p0)
}
  0x58   : > { %s2077_s20 = scalar_lea.vmem %s2345_s16, 2560  ;;  %s2172_s26 = smov [#allocation4]  }
  0x59   : > { %p2078_p3 = scmp.ne.s32.totalorder %s2345_s16, %s2077_s20  ;;  %s2082_s13 = sshll.u32 %s2172_s26, 4  ;;  %s2083_s13 = int_to_ptr.vmem [resolvable:$false] %s2082_s13 }
  0x5a   : > { %s2084_s14 = scalar_lea.vmem %s2083_s13, 5120  ;;  %p2085_p7 = scmp.lt.s32.totalorder %s2345_s16, %s2083_s13 }
  0x5b   : > { %p2080_p6 = pnand %p2078_p3, %p2066_p11  ;;  %p2086_p10 = scmp.lt.s32.totalorder %s2084_s14, %s2077_s20 }
  0x5d   : > { %p2081_p2 = pneg %p2080_p6  ;;  %p2087_p4 = por %p2086_p10, %p2085_p7 }
  0x5f   : > { %p2088_p9 = pnand %p2087_p4, %p2081_p2 }
  0x61   : > { %2091 = shalt.err (!%p2088_p9)
}
  0x62   : > { %s2678_s15 = smov 8   ;;  %s2679_s8 = smov 128  }
  0x63   : > { %1834 = dma.hbm_to_vmem [thread:$0]  (!%p2336_p12), %s2343_s11, 2560, %s2345_s16, %s2347_s17, %s2679_s8, %s2679_s8, %s2678_s15  }
  0x64   : > { %p2680_p6 = scmp.ne.s32.totalorder %s2674_s29, 0 }
  0x65   : > { %s2374_s9 = sand.u32 (!%p2680_p6), 1, %s2156_s22   ;;  %p2681_p4 = scmp.ne.s32.totalorder (!%p2680_p6), %s2672_s27, 0 }
  0x66   : > { %276 = sbr.rel (%p2680_p6) target bundleno = 1682 (0x692), region = 44  ;;  %s279_s10 = scalar_lea.sflag (!%p2680_p6), [#allocation5], %s2374_s9 }
  0x67   : > { %s1797_s30 = smul.u32 (!%p2680_p6), 160, %s2374_s9 }
  0x69   : > { %s2378_s20 = scalar_lea.vmem (!%p2680_p6), [#allocation4], %s1797_s30 }
  0x6b   : > { %2135 = dma.done.wait (%p2681_p4), %s279_s10, 2560  }
  0x6c   : > { %2137 = vsyncadd (%p2681_p4), %s279_s10, 4294964736  ;;  %p2682_p9 = scmp.eq.s32.totalorder %s2239_s25, 0 }
  0x6e   : > { %2139 = dma.done.wait (%p2682_p9), [#allocation8], 1024   ;;  %p2683_p10 = pmov %p2682_p9 }
  0x6f   : > { %p2684_p12 = pmov %p2682_p9 }
  0x70   : > { %2141 = vsyncadd (%p2683_p10), [#allocation8], 4294966272 }
  0x71   : > { %2143 = dma.done.wait (%p2684_p12), [#allocation11], 384   ;;  %p2685_p11 = pmov %p2682_p9 }
  0x72   : > { %s1469_s29 = sshll.u32 %s2374_s9, 5  ;;  %p2686_p8 = scmp.ne.s32.totalorder %s2239_s25, 0 }
  0x73   : > { %2145 = vsyncadd (%p2685_p11), [#allocation11], 4294966912  ;;  %s2393_s7 = scalar_lea.vmem [#allocation13], %s1469_s29 }
  0x74   : > { %332 = sbr.rel (%p2686_p8) target bundleno = 124 (0x7c), region = 68 }
  0x79   : > { %v333_v0 = vld [vmem:[#allocation12] sm:$0xff] }
  0x7a   : > { %v335_v1 = vld [vmem:[%s2664_s5] sm:$0xff]  ;;  %334 = vst [vmem:[#allocation2] sm:$0xff] %v333_v0 }
  0x7b   : > { %336 = vst [vmem:[#allocation3] sm:$0xff] %v335_v1 }
  0x7c PF: > { %v357_v3 = vld [vmem:[%s2378_s20 + $0x20] sm:$0xff]  ;;  %s2173_s16 = smov 119   ;;  %s2174_s17 = smov 121   ;;  %v356_v4 = vld [vmem:[%s2378_s20 + $0x18] sm:$0xff]  ;;  %v355_v5 = vld [vmem:[%s2378_s20 + $0x10] sm:$0xff]  ;;  %vm513_vm0 = vcmask 326656  }
  0x7d   : > { %1659 = vmatprep.subr.mxu1 %v357_v3  ;;  %s2175_s26 = smov 120   ;;  %s2176_s13 = smov 127   ;;  %v2413_v6 = vld [vmem:[#allocation7] sm:$0xff]  ;;  %v354_v7 = vld [vmem:[%s2378_s20 + $0x8] sm:$0xff]  ;;  %vm415_vm1 = vcmask 588800   ;;  %v2433_v11 = vld [vmem:[#allocation7 + $0x10] sm:$0xff] }
  0x7e   : > { %1660 = vmatpush3.msra.mxu1 %v357_v3  ;;  %1669 = vmatprep.mubr.msk.f32.mxu1 %vm513_vm0, %v2413_v6  ;;  %v2418_v8 = vld [vmem:[#allocation9] sm:$0xff]  ;;  %s2177_s14 = smov 1   ;;  %s2178_s15 = smov 7   ;;  %v2427_v10 = vld [vmem:[#allocation7 + $0x8] sm:$0xff]  ;;  %v2439_v12 = vld [vmem:[#allocation7 + $0x18] sm:$0xff] }
  0x7f   : > { %1661 = vmatprep.subr.mxu1 %v356_v4  ;;  %v353_v9 = vld [vmem:[%s2378_s20] sm:$0xff]  ;;  %1653 = vmatprep.mubr.msk.f32.mxu0 %vm415_vm1, %v2418_v8  ;;  %s2179_s8 = smov 8   ;;  %s2180_s30 = smov 9   ;;  %v2445_v13 = vld [vmem:[#allocation10 + $0x8] ss:$0 sm:$0xff]  ;;  %v2473_v38 = vld [vmem:[#allocation9 + $0x10] sm:$0xff] }
  0x80   : > { %1662 = vmatpush3.msra.mxu1 %v356_v4  ;;  %v2448_v17 = vld [vmem:[#allocation10 + $0x7] ss:$0 sm:$0xff]  ;;  %v2450_v18 = vld [vmem:[#allocation10 + $0x6] ss:$0 sm:$0xff]  ;;  %v2452_v21 = vld [vmem:[#allocation10 + $0x5] ss:$0 sm:$0xff] }
  0x81   : > { %v2400_v2 = vld [vmem:[#allocation2] sm:$0xff]  ;;  %1663 = vmatprep.subr.mxu1 %v355_v5  ;;  %v2457_v26 = vld [vmem:[#allocation10 + $0x3] ss:$0 sm:$0xff]  ;;  %v2459_v28 = vld [vmem:[#allocation10 + $0x2] ss:$0 sm:$0xff]  ;;  %s1546_s10 = sshll.u32 %s2239_s25, 9 }
  0x82   : > { %408 = vrot.lane.b32.xlu0 %v2400_v2, %s2173_s16  ;;  %394 = vrot.lane.b32.xlu1 %v2400_v2, %s2174_s17  ;;  %v2462_v31 = vld [vmem:[#allocation10 + $0x1] ss:$0 sm:$0xff]  ;;  %v2467_v34 = vld [vmem:[#allocation10] ss:$0 sm:$0xff]  ;;  %v2471_v37 = vld [vmem:[#allocation9 + $0x8] sm:$0xff]  ;;  %s2612_s11 = scalar_lea.hbm %s2665_s6, %s1546_s10  ;;  %p2687_p5 = scmp.ne.s32.totalorder %s2676_s18, 0 }
  0x83   : > { %1664 = vmatpush3.msra.mxu1 %v355_v5  ;;  %v2479_v39 = vld [vmem:[#allocation9 + $0x18] sm:$0xff]  ;;  %v1494_v4 = vld [vmem:[%s2378_s20 + $0x48] sm:$0xff]  ;;  %s2181_s25 = smov [#allocation13]  }
  0x84   : > { %1665 = vmatprep.subr.mxu1 %v354_v7  ;;  %v630_v61 = vld [vmem:[#allocation3] sm:$0xff] }
  0x85   : > { %1666 = vmatpush3.msra.mxu1 %v354_v7  ;;  %v1493_v7 = vld [vmem:[%s2378_s20 + $0x40] sm:$0xff] }
  0x86   : > { %401 = vrot.lane.b32.xlu0 %v2400_v2, %s2175_s26  ;;  %387 = vrot.lane.b32.xlu1 %v2400_v2, %s2176_s13 }
  0x87   : > { %1667 = vmatprep.subr.mxu1 %v353_v9 }
  0x88   : > { %1668 = vmatpush3.msra.mxu1 %v353_v9 }
  0x89   : > { %1670 = vmatmul.mubr.msk.f32.vlgmr.msra.gmra.mxu1 %vm513_vm0, %v2427_v10 }
  0x8a   : > { %380 = vrot.lane.b32.xlu0 %v2400_v2, %s2177_s14  ;;  %373 = vrot.lane.b32.xlu1 %v2400_v2, %s2178_s15 }
  0x8b   : > { %1672 = vmatprep.mubr.msk.f32.mxu1 %vm513_vm0, %v2433_v11 }
  0x8d   : > { %1673 = vmatmul.mubr.msk.f32.gmra.mxu1 %vm513_vm0, %v2439_v12 }
  0x8e   : > { %366 = vrot.lane.b32.xlu0 %v2400_v2, %s2179_s8  ;;  %359 = vrot.lane.b32.xlu1 %v2400_v2, %s2180_s30 }
  0x8f   : > { %1693 = vmatprep.mubr.msk.f32.mxu1 %vm415_vm1, %v2418_v8 }
  0xf4   : > { %v409_v14 = vpop.permute.xlu0 %408  ;;  %v395_v15 = vpop.permute.xlu1 %394 }
  0xf5   : > { %v414_v16 = vmul.f32 %v2445_v13, %v409_v14  ;;  %v400_v23 = vmul.f32 %v2450_v18, %v395_v15  ;;  %v1492_v15 = vld [vmem:[%s2378_s20 + $0x38] sm:$0xff] }
  0xf7   : > { %1635 = vmatprep.subr.mxu0 %v414_v16 }
  0xf8   : > { %v402_v19 = vpop.permute.xlu0 %401  ;;  %1636 = vmatpush3.msra.mxu0 %v414_v16  ;;  %v388_v20 = vpop.permute.xlu1 %387  ;;  %v1491_v16 = vld [vmem:[%s2378_s20 + $0x30] sm:$0xff] }
  0xf9   : > { %v407_v22 = vmul.f32 %v2448_v17, %v402_v19  ;;  %v393_v24 = vmul.f32 %v2452_v21, %v388_v20  ;;  %v1490_v19 = vld [vmem:[%s2378_s20 + $0x28] sm:$0xff] }
  0xfb   : > { %1637 = vmatprep.subr.mxu0 %v407_v22 }
  0xfc   : > { %1638 = vmatpush3.msra.mxu0 %v407_v22  ;;  %v381_v25 = vpop.permute.xlu0 %380  ;;  %v374_v27 = vpop.permute.xlu1 %373 }
  0xfd   : > { %1639 = vmatprep.subr.mxu0 %v400_v23  ;;  %v386_v29 = vmul.f32 %v2457_v26, %v381_v25  ;;  %v379_v32 = vmul.f32 %v2459_v28, %v374_v27 }
  0xfe   : > { %1640 = vmatpush3.msra.mxu0 %v400_v23 }
  0xff   : > { %1641 = vmatprep.subr.mxu0 %v393_v24 }
 0x100   : > { %1642 = vmatpush3.msra.mxu0 %v393_v24  ;;  %v367_v30 = vpop.permute.xlu0 %366  ;;  %v360_v33 = vpop.permute.xlu1 %359 }
 0x101   : > { %1643 = vmatprep.subr.mxu0 %v2400_v2  ;;  %v372_v35 = vmul.f32 %v2462_v31, %v367_v30  ;;  %v365_v36 = vmul.f32 %v2467_v34, %v360_v33 }
 0x102   : > { %1644 = vmatpush3.msra.mxu0 %v2400_v2 }
 0x103   : > { %1645 = vmatprep.subr.mxu0 %v386_v29 }
 0x104   : > { %1646 = vmatpush3.msra.mxu0 %v386_v29 }
 0x105   : > { %1647 = vmatprep.subr.mxu0 %v379_v32 }
 0x106   : > { %1648 = vmatpush3.msra.mxu0 %v379_v32 }
 0x107   : > { %1649 = vmatprep.subr.mxu0 %v372_v35 }
 0x108   : > { %1650 = vmatpush3.msra.mxu0 %v372_v35 }
 0x109   : > { %1651 = vmatprep.subr.mxu0 %v365_v36 }
 0x10a   : > { %1652 = vmatpush3.msra.mxu0 %v365_v36 }
 0x10b   : > { %1654 = vmatmul.mubr.msk.f32.vlgmr.msra.gmra.mxu0 %vm415_vm1, %v2471_v37  ;;  %1699 = vmatprep.subr.mxu0 %v1494_v4 }
 0x10c   : > { %1656 = vmatprep.mubr.msk.f32.mxu0 %vm415_vm1, %v2473_v38  ;;  %1700 = vmatpush3.msra.mxu0 %v1494_v4 }
 0x10d   : > { %1701 = vmatprep.subr.mxu0 %v1493_v7 }
 0x10e   : > { %1702 = vmatpush3.msra.mxu0 %v1493_v7 }
 0x10f   : > { %1657 = vmatmul.mubr.msk.f32.gmra.mxu0 %vm415_vm1, %v2479_v39  ;;  %1703 = vmatprep.subr.mxu0 %v1492_v15 }
 0x110   : > { %1709 = vmatprep.mubr.msk.f32.mxu0 %vm513_vm0, %v2413_v6  ;;  %1704 = vmatpush3.msra.mxu0 %v1492_v15 }
 0x111   : > { %1705 = vmatprep.subr.mxu0 %v1491_v16 }
 0x112   : > { %1706 = vmatpush3.msra.mxu0 %v1491_v16  ;;  %v1510_v16 = vld [vmem:[%s2378_s20 + $0x68] sm:$0xff] }
 0x113   : > { %1707 = vmatprep.subr.mxu0 %v1490_v19 }
 0x114   : > { %1708 = vmatpush3.msra.mxu0 %v1490_v19 }
 0x115   : > { %1710 = vmatmul.mubr.msk.f32.vlgmr.msra.gmra.mxu0 %vm513_vm0, %v2427_v10 }
 0x116   : > { %1712 = vmatprep.mubr.msk.f32.mxu0 %vm513_vm0, %v2433_v11 }
 0x119   : > { %1713 = vmatmul.mubr.msk.f32.gmra.mxu0 %vm513_vm0, %v2439_v12 }
 0x11a   : > { %1733 = vmatprep.mubr.msk.f32.mxu0 %vm415_vm1, %v2418_v8 }
 0x149   : > { %v1671_v40 = vpop.f32.mrf.mxu1 }
 0x14b   : > { %v592_v43 = vpop.f32.mrf.mxu1 }
 0x14d   : > { %v1674_v49 = vpop.f32.mrf.mxu1 }
 0x14f   : > { %v602_v52 = vpop.f32.mrf.mxu1 }
 0x1cb   : > { %v1655_v41 = vpop.f32.mrf.mxu0 }
 0x1cc   : > { %v598_v42 = vadd.f32 %v1671_v40, %v1655_v41 }
 0x1cd   : > { %v494_v44 = vpop.f32.mrf.mxu0 }
 0x1ce   : > { %v1488_v45 = vmul.f32 -1.442695, %v598_v42  ;;  %v593_v46 = vadd.f32 %v592_v43, %v494_v44 }
 0x1cf   : > { %v1658_v48 = vpop.f32.mrf.mxu0 }
 0x1d0   : > { %1896 = vpow2.f32 %v1488_v45  ;;  %v1487_v47 = vmul.f32 -1.442695, %v593_v46  ;;  %v608_v50 = vadd.f32 %v1674_v49, %v1658_v48 }
 0x1d1   : > { %v504_v51 = vpop.f32.mrf.mxu0 }
 0x1d2   : > { %1898 = vpow2.f32 %v1487_v47  ;;  %v1489_v53 = vmul.f32 -1.442695, %v608_v50  ;;  %v603_v55 = vadd.f32 %v602_v52, %v504_v51 }
 0x1d4   : > { %1900 = vpow2.f32 %v1489_v53 }
 0x1d5   : > { %v1711_v44 = vpop.f32.mrf.mxu0 }
 0x1d7   : > { %v821_v47 = vpop.f32.mrf.mxu0 }
 0x1d9   : > { %v1714_v53 = vpop.f32.mrf.mxu0 }
 0x1dd   : > { %v1897_v54 = vpop.eup %1896 }
 0x1de   : > { %v620_v56 = vadd.f32 1.0, %v1897_v54 }
 0x1df   : > { %v1899_v57 = vpop.eup %1898 }
 0x1e0   : > { %1902 = vrcp.f32 %v620_v56  ;;  %v614_v58 = vadd.f32 1.0, %v1899_v57  ;;  %v831_v56 = vpop.f32.mrf.mxu0 }
 0x1e1   : > { %1904 = vtanh.f32 %v603_v55  ;;  %v1901_v59 = vpop.eup %1900 }
 0x1e2   : > { %1906 = vrcp.f32 %v614_v58  ;;  %v627_v0 = vadd.f32 1.0, %v1901_v59 }
 0x1e4   : > { %1908 = vrcp.f32 %v627_v0 }
 0x1ed   : > { %v1903_v60 = vpop.eup %1902 }
 0x1ee   : > { %v1905_v62 = vpop.eup %1904  ;;  %v631_v1 = vmul.f32 %v1903_v60, %v630_v61 }
 0x1ef   : > { %v1907_v63 = vpop.eup %1906 }
 0x1f0   : > { %v632_v2 = vmul.f32 %v1907_v63, %v1905_v62 }
 0x1f1   : > { %v1909_v5 = vpop.eup %1908 }
 0x1f2   : > { %v2485_v3 = vadd.f32 %v632_v2, %v631_v1 }
 0x1f4   : > { %1910 = vtanh.f32 %v2485_v3 }
 0x201   : > { %v1911_v9 = vpop.eup %1910 }
 0x202   : > { %v635_v14 = vmul.f32 %v1911_v9, %v1909_v5 }
 0x204   : > { %638 = vst [vmem:[%s2393_s7] sm:$0xff] %v635_v14  ;;  %664 = vrot.lane.b32.xlu1 %v635_v14, %s2175_s26  ;;  %667 = vrot.lane.b32.xlu0 %v635_v14, %s2173_s16 }
 0x208   : > { %658 = vrot.lane.b32.xlu1 %v635_v14, %s2176_s13  ;;  %661 = vrot.lane.b32.xlu0 %v635_v14, %s2174_s17 }
 0x20c   : > { %652 = vrot.lane.b32.xlu1 %v635_v14, %s2178_s15  ;;  %655 = vrot.lane.b32.xlu0 %v635_v14, %s2177_s14 }
 0x210   : > { %646 = vrot.lane.b32.xlu1 %v635_v14, %s2180_s30  ;;  %649 = vrot.lane.b32.xlu0 %v635_v14, %s2179_s8 }
 0x276   : > { %v665_v20 = vpop.permute.xlu1 %664  ;;  %v668_v22 = vpop.permute.xlu0 %667 }
 0x277   : > { %v669_v23 = vmul.f32 %v2445_v13, %v668_v22  ;;  %v666_v24 = vmul.f32 %v2448_v17, %v665_v20  ;;  %v1509_v22 = vld [vmem:[%s2378_s20 + $0x60] sm:$0xff] }
 0x279   : > { %1675 = vmatprep.subr.mxu1 %v669_v23 }
 0x27a   : > { %v659_v25 = vpop.permute.xlu1 %658  ;;  %1676 = vmatpush3.msra.mxu1 %v669_v23  ;;  %v662_v27 = vpop.permute.xlu0 %661  ;;  %v1507_v23 = vld [vmem:[%s2378_s20 + $0x50] sm:$0xff] }
 0x27b   : > { %v663_v29 = vmul.f32 %v2450_v18, %v662_v27  ;;  %1677 = vmatprep.subr.mxu1 %v666_v24  ;;  %v660_v30 = vmul.f32 %v2452_v21, %v659_v25 }
 0x27c   : > { %1678 = vmatpush3.msra.mxu1 %v666_v24 }
 0x27d   : > { %1679 = vmatprep.subr.mxu1 %v663_v29 }
 0x27e   : > { %v653_v32 = vpop.permute.xlu1 %652  ;;  %1680 = vmatpush3.msra.mxu1 %v663_v29  ;;  %v656_v33 = vpop.permute.xlu0 %655 }
 0x27f   : > { %1681 = vmatprep.subr.mxu1 %v660_v30  ;;  %v657_v35 = vmul.f32 %v2457_v26, %v656_v33  ;;  %v654_v40 = vmul.f32 %v2459_v28, %v653_v32 }
 0x280   : > { %1682 = vmatpush3.msra.mxu1 %v660_v30 }
 0x281   : > { %1683 = vmatprep.subr.mxu1 %v635_v14 }
 0x282   : > { %1684 = vmatpush3.msra.mxu1 %v635_v14  ;;  %v650_v36 = vpop.permute.xlu0 %649  ;;  %v647_v41 = vpop.permute.xlu1 %646  ;;  %v1511_v14 = vld [vmem:[%s2378_s20 + $0x70] sm:$0xff] }
 0x283   : > { %1685 = vmatprep.subr.mxu1 %v657_v35  ;;  %v651_v42 = vmul.f32 %v2462_v31, %v650_v36  ;;  %v648_v43 = vmul.f32 %v2467_v34, %v647_v41 }
 0x284   : > { %1686 = vmatpush3.msra.mxu1 %v657_v35 }
 0x285   : > { %1687 = vmatprep.subr.mxu1 %v654_v40 }
 0x286   : > { %1688 = vmatpush3.msra.mxu1 %v654_v40 }
 0x287   : > { %1689 = vmatprep.subr.mxu1 %v651_v42 }
 0x288   : > { %1690 = vmatpush3.msra.mxu1 %v651_v42 }
 0x289   : > { %1691 = vmatprep.subr.mxu1 %v648_v43 }
 0x28a   : > { %1692 = vmatpush3.msra.mxu1 %v648_v43 }
 0x28b   : > { %1694 = vmatmul.mubr.msk.f32.vlgmr.msra.gmra.mxu1 %vm415_vm1, %v2471_v37  ;;  %1739 = vmatprep.subr.mxu1 %v1511_v14 }
 0x28c   : > { %1696 = vmatprep.mubr.msk.f32.mxu1 %vm415_vm1, %v2473_v38  ;;  %1740 = vmatpush3.msra.mxu1 %v1511_v14 }
 0x28d   : > { %1741 = vmatprep.subr.mxu1 %v1510_v16 }
 0x28e   : > { %1742 = vmatpush3.msra.mxu1 %v1510_v16  ;;  %v1528_v16 = vld [vmem:[%s2378_s20 + $0x98] sm:$0xff] }
 0x28f   : > { %1697 = vmatmul.mubr.msk.f32.gmra.mxu1 %vm415_vm1, %v2479_v39  ;;  %1743 = vmatprep.subr.mxu1 %v1509_v22 }
 0x290   : > { %1749 = vmatprep.mubr.msk.f32.mxu1 %vm513_vm0, %v2413_v6  ;;  %1744 = vmatpush3.msra.mxu1 %v1509_v22 }
 0x34b   : > { %v1695_v45 = vpop.f32.mrf.mxu1 }
 0x34c   : > { %v827_v46 = vadd.f32 %v1711_v44, %v1695_v45 }
 0x34d   : > { %v736_v48 = vpop.f32.mrf.mxu1 }
 0x34e   : > { %v1504_v49 = vmul.f32 -1.442695, %v827_v46  ;;  %v822_v50 = vadd.f32 %v821_v47, %v736_v48 }
 0x34f   : > { %v1698_v52 = vpop.f32.mrf.mxu1 }
 0x350   : > { %1912 = vpow2.f32 %v1504_v49  ;;  %v1503_v51 = vmul.f32 -1.442695, %v822_v50  ;;  %v837_v54 = vadd.f32 %v1714_v53, %v1698_v52 }
 0x351   : > { %v746_v55 = vpop.f32.mrf.mxu1 }
 0x352   : > { %1914 = vpow2.f32 %v1503_v51  ;;  %v1505_v57 = vmul.f32 -1.442695, %v837_v54  ;;  %v832_v59 = vadd.f32 %v831_v56, %v746_v55 }
 0x354   : > { %1916 = vpow2.f32 %v1505_v57 }
 0x35d   : > { %v1913_v58 = vpop.eup %1912 }
 0x35e   : > { %v849_v60 = vadd.f32 1.0, %v1913_v58 }
 0x35f   : > { %v1915_v61 = vpop.eup %1914 }
 0x360   : > { %1918 = vrcp.f32 %v849_v60  ;;  %v843_v62 = vadd.f32 1.0, %v1915_v61 }
 0x361   : > { %1920 = vtanh.f32 %v832_v59  ;;  %v1917_v63 = vpop.eup %1916 }
 0x362   : > { %1922 = vrcp.f32 %v843_v62  ;;  %v856_v4 = vadd.f32 1.0, %v1917_v63 }
 0x364   : > { %1924 = vrcp.f32 %v856_v4 }
 0x36d   : > { %v1919_v0 = vpop.eup %1918 }
 0x36e   : > { %v1921_v1 = vpop.eup %1920  ;;  %v860_v5 = vmul.f32 %v1919_v0, %v2485_v3  ;;  %v1508_v3 = vld [vmem:[%s2378_s20 + $0x58] sm:$0xff] }
 0x36f   : > { %v1923_v2 = vpop.eup %1922  ;;  %1745 = vmatprep.subr.mxu1 %v1508_v3 }
 0x370   : > { %v861_v7 = vmul.f32 %v1923_v2, %v1921_v1  ;;  %1746 = vmatpush3.msra.mxu1 %v1508_v3 }
 0x371   : > { %v1925_v15 = vpop.eup %1924  ;;  %1747 = vmatprep.subr.mxu1 %v1507_v23 }
 0x372   : > { %v2527_v9 = vadd.f32 %v861_v7, %v860_v5  ;;  %1748 = vmatpush3.msra.mxu1 %v1507_v23  ;;  %v1526_v23 = vld [vmem:[%s2378_s20 + $0x88] sm:$0xff] }
 0x373   : > { %1750 = vmatmul.mubr.msk.f32.vlgmr.msra.gmra.mxu1 %vm513_vm0, %v2427_v10 }
 0x374   : > { %1926 = vtanh.f32 %v2527_v9  ;;  %1752 = vmatprep.mubr.msk.f32.mxu1 %vm513_vm0, %v2433_v11 }
 0x377   : > { %1753 = vmatmul.mubr.msk.f32.gmra.mxu1 %vm513_vm0, %v2439_v12 }
 0x378   : > { %1773 = vmatprep.mubr.msk.f32.mxu1 %vm415_vm1, %v2418_v8 }
 0x381   : > { %v1927_v19 = vpop.eup %1926 }
 0x382   : > { %v864_v20 = vmul.f32 %v1927_v19, %v1925_v15 }
 0x384   : > { %1506 = vst [vmem:[%s2393_s7 + $0x8] sm:$0xff] %v864_v20  ;;  %894 = vrot.lane.b32.xlu1 %v864_v20, %s2175_s26  ;;  %897 = vrot.lane.b32.xlu0 %v864_v20, %s2173_s16 }
 0x388   : > { %888 = vrot.lane.b32.xlu1 %v864_v20, %s2176_s13  ;;  %891 = vrot.lane.b32.xlu0 %v864_v20, %s2174_s17 }
 0x38c   : > { %882 = vrot.lane.b32.xlu1 %v864_v20, %s2178_s15  ;;  %885 = vrot.lane.b32.xlu0 %v864_v20, %s2177_s14 }
 0x390   : > { %876 = vrot.lane.b32.xlu1 %v864_v20, %s2180_s30  ;;  %879 = vrot.lane.b32.xlu0 %v864_v20, %s2179_s8 }
 0x3f6   : > { %v895_v24 = vpop.permute.xlu1 %894  ;;  %v898_v25 = vpop.permute.xlu0 %897 }
 0x3f7   : > { %v899_v27 = vmul.f32 %v2445_v13, %v898_v25  ;;  %v896_v29 = vmul.f32 %v2448_v17, %v895_v24  ;;  %v1524_v24 = vld [vmem:[%s2378_s20 + $0x78] sm:$0xff] }
 0x3f9   : > { %1715 = vmatprep.subr.mxu0 %v899_v27 }
 0x3fa   : > { %v889_v30 = vpop.permute.xlu1 %888  ;;  %1716 = vmatpush3.msra.mxu0 %v899_v27  ;;  %v892_v32 = vpop.permute.xlu0 %891 }
 0x3fb   : > { %v893_v33 = vmul.f32 %v2450_v18, %v892_v32  ;;  %1717 = vmatprep.subr.mxu0 %v896_v29  ;;  %v890_v35 = vmul.f32 %v2452_v21, %v889_v30 }
 0x3fc   : > { %1718 = vmatpush3.msra.mxu0 %v896_v29 }
 0x3fd   : > { %1719 = vmatprep.subr.mxu0 %v893_v33 }
 0x3fe   : > { %v883_v36 = vpop.permute.xlu1 %882  ;;  %1720 = vmatpush3.msra.mxu0 %v893_v33  ;;  %v886_v8 = vpop.permute.xlu0 %885 }
 0x3ff   : > { %1721 = vmatprep.subr.mxu0 %v890_v35  ;;  %v887_v40 = vmul.f32 %v2457_v26, %v886_v8  ;;  %v884_v42 = vmul.f32 %v2459_v28, %v883_v36 }
 0x400   : > { %1722 = vmatpush3.msra.mxu0 %v890_v35 }
 0x401   : > { %1723 = vmatprep.subr.mxu0 %v864_v20 }
 0x402   : > { %1724 = vmatpush3.msra.mxu0 %v864_v20  ;;  %v880_v41 = vpop.permute.xlu0 %879  ;;  %v877_v43 = vpop.permute.xlu1 %876  ;;  %v1527_v20 = vld [vmem:[%s2378_s20 + $0x90] sm:$0xff] }
 0x403   : > { %1725 = vmatprep.subr.mxu0 %v887_v40  ;;  %v881_v44 = vmul.f32 %v2462_v31, %v880_v41  ;;  %v878_v45 = vmul.f32 %v2467_v34, %v877_v43 }
 0x404   : > { %1726 = vmatpush3.msra.mxu0 %v887_v40 }
 0x405   : > { %1727 = vmatprep.subr.mxu0 %v884_v42 }
 0x406   : > { %1728 = vmatpush3.msra.mxu0 %v884_v42 }
 0x407   : > { %1729 = vmatprep.subr.mxu0 %v881_v44 }
 0x408   : > { %1730 = vmatpush3.msra.mxu0 %v881_v44 }
 0x409   : > { %1731 = vmatprep.subr.mxu0 %v878_v45 }
 0x40a   : > { %1732 = vmatpush3.msra.mxu0 %v878_v45 }
 0x40b   : > { %1734 = vmatmul.mubr.msk.f32.vlgmr.msra.gmra.mxu0 %vm415_vm1, %v2471_v37  ;;  %1779 = vmatprep.subr.mxu0 %v1528_v16 }
 0x40c   : > { %1736 = vmatprep.mubr.msk.f32.mxu0 %vm415_vm1, %v2473_v38  ;;  %1780 = vmatpush3.msra.mxu0 %v1528_v16 }
 0x40d   : > { %1781 = vmatprep.subr.mxu0 %v1527_v20 }
 0x40e   : > { %1782 = vmatpush3.msra.mxu0 %v1527_v20 }
 0x40f   : > { %1737 = vmatmul.mubr.msk.f32.gmra.mxu0 %vm415_vm1, %v2479_v39  ;;  %1783 = vmatprep.subr.mxu0 %v1526_v23 }
 0x410   : > { %1789 = vmatprep.mubr.msk.f32.mxu0 %vm513_vm0, %v2413_v6  ;;  %1784 = vmatpush3.msra.mxu0 %v1526_v23 }
 0x433   : > { %v1751_v46 = vpop.f32.mrf.mxu1 }
 0x435   : > { %v1051_v49 = vpop.f32.mrf.mxu1 }
 0x437   : > { %v1754_v55 = vpop.f32.mrf.mxu1 }
 0x439   : > { %v1061_v58 = vpop.f32.mrf.mxu1 }
 0x4cb   : > { %v1735_v47 = vpop.f32.mrf.mxu0 }
 0x4cc   : > { %v1057_v48 = vadd.f32 %v1751_v46, %v1735_v47 }
 0x4cd   : > { %v966_v50 = vpop.f32.mrf.mxu0 }
 0x4ce   : > { %v1521_v51 = vmul.f32 -1.442695, %v1057_v48  ;;  %v1052_v52 = vadd.f32 %v1051_v49, %v966_v50 }
 0x4cf   : > { %v1738_v54 = vpop.f32.mrf.mxu0 }
 0x4d0   : > { %1928 = vpow2.f32 %v1521_v51  ;;  %v1520_v53 = vmul.f32 -1.442695, %v1052_v52  ;;  %v1067_v56 = vadd.f32 %v1754_v55, %v1738_v54 }
 0x4d1   : > { %v976_v57 = vpop.f32.mrf.mxu0 }
 0x4d2   : > { %1930 = vpow2.f32 %v1520_v53  ;;  %v1522_v59 = vmul.f32 -1.442695, %v1067_v56  ;;  %v1062_v61 = vadd.f32 %v1061_v58, %v976_v57 }
 0x4d4   : > { %1932 = vpow2.f32 %v1522_v59 }
 0x4dd   : > { %v1929_v60 = vpop.eup %1928 }
 0x4de   : > { %v1079_v62 = vadd.f32 1.0, %v1929_v60 }
 0x4df   : > { %v1931_v6 = vpop.eup %1930 }
 0x4e0   : > { %1934 = vrcp.f32 %v1079_v62  ;;  %v1073_v63 = vadd.f32 1.0, %v1931_v6 }
 0x4e1   : > { %1936 = vtanh.f32 %v1062_v61  ;;  %v1933_v0 = vpop.eup %1932 }
 0x4e2   : > { %1938 = vrcp.f32 %v1073_v63  ;;  %v1086_v5 = vadd.f32 1.0, %v1933_v0 }
 0x4e4   : > { %1940 = vrcp.f32 %v1086_v5 }
 0x4ed   : > { %v1935_v1 = vpop.eup %1934 }
 0x4ee   : > { %v1937_v2 = vpop.eup %1936  ;;  %v1090_v7 = vmul.f32 %v1935_v1, %v2527_v9  ;;  %v1525_v9 = vld [vmem:[%s2378_s20 + $0x80] sm:$0xff]  ;;  %s1343_s20 = sshll.u32 %s2393_s7, 4  ;;  %s2614_s20 = int_to_ptr.vmem [resolvable:$true] %s1343_s20 }
 0x4ef   : > { %v1939_v4 = vpop.eup %1938  ;;  %1785 = vmatprep.subr.mxu0 %v1525_v9 }
 0x4f0   : > { %v1091_v14 = vmul.f32 %v1939_v4, %v1937_v2  ;;  %1786 = vmatpush3.msra.mxu0 %v1525_v9 }
 0x4f1   : > { %v1941_v19 = vpop.eup %1940  ;;  %1787 = vmatprep.subr.mxu0 %v1524_v24 }
 0x4f2   : > { %v2569_v15 = vadd.f32 %v1091_v14, %v1090_v7  ;;  %1788 = vmatpush3.msra.mxu0 %v1524_v24 }
 0x4f3   : > { %1790 = vmatmul.mubr.msk.f32.vlgmr.msra.gmra.mxu0 %vm513_vm0, %v2427_v10 }
 0x4f4   : > { %1942 = vtanh.f32 %v2569_v15  ;;  %1792 = vmatprep.mubr.msk.f32.mxu0 %vm513_vm0, %v2433_v11 }
 0x4f7   : > { %1793 = vmatmul.mubr.msk.f32.gmra.mxu0 %vm513_vm0, %v2439_v12 }
 0x501   : > { %v1943_v22 = vpop.eup %1942 }
 0x502   : > { %v1094_v3 = vmul.f32 %v1943_v22, %v1941_v19 }
 0x504   : > { %1523 = vst [vmem:[%s2393_s7 + $0x10] sm:$0xff] %v1094_v3  ;;  %1124 = vrot.lane.b32.xlu1 %v1094_v3, %s2175_s26  ;;  %1127 = vrot.lane.b32.xlu0 %v1094_v3, %s2173_s16  ;;  %s1330_s16 = scalar_lea.sflag [#allocation6], %s2374_s9  ;;  %s2096_s26 = sshll.u32 %s2181_s25, 4  ;;  %s2097_s26 = int_to_ptr.vmem [resolvable:$false] %s2096_s26 }
 0x505   : > { %p2099_p3 = scmp.lt.s32.totalorder %s2614_s20, %s2097_s26 }
 0x508   : > { %1118 = vrot.lane.b32.xlu1 %v1094_v3, %s2176_s13  ;;  %1121 = vrot.lane.b32.xlu0 %v1094_v3, %s2174_s17  ;;  %s2092_s17 = scalar_lea.vmem %s2614_s20, 512  ;;  %s2098_s13 = scalar_lea.vmem %s2097_s26, 1024 }
 0x509   : > { %p2093_p13 = scmp.ne.s32.totalorder %s2614_s20, %s2092_s17  ;;  %p2100_p2 = scmp.lt.s32.totalorder %s2098_s13, %s2092_s17 }
 0x50b   : > { %p2094_p1 = pnand %p2093_p13, %p2687_p5  ;;  %p2101_p7 = por %p2100_p2, %p2099_p3 }
 0x50c   : > { %1112 = vrot.lane.b32.xlu1 %v1094_v3, %s2178_s15  ;;  %1115 = vrot.lane.b32.xlu0 %v1094_v3, %s2177_s14 }
 0x50d   : > { %p2095_p0 = pneg %p2094_p1 }
 0x50f   : > { %p2102_p6 = pnand %p2101_p7, %p2095_p0 }
 0x510   : > { %1106 = vrot.lane.b32.xlu1 %v1094_v3, %s2180_s30  ;;  %1109 = vrot.lane.b32.xlu0 %v1094_v3, %s2179_s8 }
 0x576   : > { %v1125_v25 = vpop.permute.xlu1 %1124  ;;  %v1128_v27 = vpop.permute.xlu0 %1127 }
 0x577   : > { %v1129_v29 = vmul.f32 %v2445_v13, %v1128_v27  ;;  %v1126_v10 = vmul.f32 %v2448_v17, %v1125_v25 }
 0x579   : > { %1755 = vmatprep.subr.mxu1 %v1129_v29 }
 0x57a   : > { %v1119_v30 = vpop.permute.xlu1 %1118  ;;  %1756 = vmatpush3.msra.mxu1 %v1129_v29  ;;  %v1122_v32 = vpop.permute.xlu0 %1121 }
 0x57b   : > { %v1123_v33 = vmul.f32 %v2450_v18, %v1122_v32  ;;  %1757 = vmatprep.subr.mxu1 %v1126_v10  ;;  %v1120_v11 = vmul.f32 %v2452_v21, %v1119_v30 }
 0x57c   : > { %1758 = vmatpush3.msra.mxu1 %v1126_v10 }
 0x57d   : > { %1759 = vmatprep.subr.mxu1 %v1123_v33 }
 0x57e   : > { %v1113_v12 = vpop.permute.xlu1 %1112  ;;  %1760 = vmatpush3.msra.mxu1 %v1123_v33  ;;  %v1116_v35 = vpop.permute.xlu0 %1115 }
 0x57f   : > { %1761 = vmatprep.subr.mxu1 %v1120_v11  ;;  %v1117_v13 = vmul.f32 %v2457_v26, %v1116_v35  ;;  %v1114_v36 = vmul.f32 %v2459_v28, %v1113_v12 }
 0x580   : > { %1762 = vmatpush3.msra.mxu1 %v1120_v11 }
 0x581   : > { %1763 = vmatprep.subr.mxu1 %v1094_v3 }
 0x582   : > { %1764 = vmatpush3.msra.mxu1 %v1094_v3  ;;  %v1110_v17 = vpop.permute.xlu0 %1109  ;;  %v1107_v8 = vpop.permute.xlu1 %1106 }
 0x583   : > { %1765 = vmatprep.subr.mxu1 %v1117_v13  ;;  %v1111_v18 = vmul.f32 %v2462_v31, %v1110_v17  ;;  %v1108_v21 = vmul.f32 %v2467_v34, %v1107_v8 }
 0x584   : > { %1766 = vmatpush3.msra.mxu1 %v1117_v13 }
 0x585   : > { %1767 = vmatprep.subr.mxu1 %v1114_v36 }
 0x586   : > { %1768 = vmatpush3.msra.mxu1 %v1114_v36 }
 0x587   : > { %1769 = vmatprep.subr.mxu1 %v1111_v18 }
 0x588   : > { %1770 = vmatpush3.msra.mxu1 %v1111_v18 }
 0x589   : > { %1771 = vmatprep.subr.mxu1 %v1108_v21 }
 0x58a   : > { %1772 = vmatpush3.msra.mxu1 %v1108_v21 }
 0x58b   : > { %1774 = vmatmul.mubr.msk.f32.vlgmr.msra.gmra.mxu1 %vm415_vm1, %v2471_v37 }
 0x58c   : > { %1776 = vmatprep.mubr.msk.f32.mxu1 %vm415_vm1, %v2473_v38 }
 0x58f   : > { %1777 = vmatmul.mubr.msk.f32.gmra.mxu1 %vm415_vm1, %v2479_v39 }
 0x5b3   : > { %v1791_v26 = vpop.f32.mrf.mxu0 }
 0x5b5   : > { %v1281_v40 = vpop.f32.mrf.mxu0 }
 0x5b7   : > { %v1794_v45 = vpop.f32.mrf.mxu0 }
 0x5b9   : > { %v1291_v47 = vpop.f32.mrf.mxu0 }
 0x64b   : > { %v1775_v28 = vpop.f32.mrf.mxu1 }
 0x64c   : > { %v1287_v31 = vadd.f32 %v1791_v26, %v1775_v28 }
 0x64d   : > { %v1196_v41 = vpop.f32.mrf.mxu1 }
 0x64e   : > { %v1538_v42 = vmul.f32 -1.442695, %v1287_v31  ;;  %v1282_v34 = vadd.f32 %v1281_v40, %v1196_v41 }
 0x64f   : > { %v1778_v44 = vpop.f32.mrf.mxu1 }
 0x650   : > { %1944 = vpow2.f32 %v1538_v42  ;;  %v1537_v43 = vmul.f32 -1.442695, %v1282_v34  ;;  %v1297_v46 = vadd.f32 %v1794_v45, %v1778_v44 }
 0x651   : > { %v1206_v37 = vpop.f32.mrf.mxu1 }
 0x652   : > { %1946 = vpow2.f32 %v1537_v43  ;;  %v1539_v48 = vmul.f32 -1.442695, %v1297_v46  ;;  %v1292_v49 = vadd.f32 %v1291_v47, %v1206_v37 }
 0x654   : > { %1948 = vpow2.f32 %v1539_v48 }
 0x65d   : > { %v1945_v38 = vpop.eup %1944 }
 0x65e   : > { %v1309_v50 = vadd.f32 1.0, %v1945_v38 }
 0x65f   : > { %v1947_v39 = vpop.eup %1946 }
 0x660   : > { %1950 = vrcp.f32 %v1309_v50  ;;  %v1303_v51 = vadd.f32 1.0, %v1947_v39 }
 0x661   : > { %1952 = vtanh.f32 %v1292_v49  ;;  %v1949_v52 = vpop.eup %1948 }
 0x662   : > { %1954 = vrcp.f32 %v1303_v51  ;;  %v1316_v56 = vadd.f32 1.0, %v1949_v52 }
 0x664   : > { %1956 = vrcp.f32 %v1316_v56 }
 0x66d   : > { %v1951_v53 = vpop.eup %1950 }
 0x66e   : > { %v1953_v54 = vpop.eup %1952  ;;  %v1320_v57 = vmul.f32 %v1951_v53, %v2569_v15 }
 0x66f   : > { %v1955_v55 = vpop.eup %1954 }
 0x670   : > { %v1321_v58 = vmul.f32 %v1955_v55, %v1953_v54 }
 0x671   : > { %v1957_v60 = vpop.eup %1956 }
 0x672   : > { %v1322_v59 = vadd.f32 %v1321_v58, %v1320_v57 }
 0x674   : > { %1958 = vtanh.f32 %v1322_v59  ;;  %1325 = vst [vmem:[#allocation3] sm:$0xff] %v1322_v59 }
 0x681   : > { %v1959_v61 = vpop.eup %1958 }
 0x682   : > { %v1324_v62 = vmul.f32 %v1959_v61, %v1957_v60 }
 0x684   : > { %1326 = vst [vmem:[#allocation2] sm:$0xff] %v1324_v62  ;;  %1540 = vst [vmem:[%s2393_s7 + $0x18] sm:$0xff] %v1324_v62 }
 0x685   : > { %2105 = shalt.err (!%p2102_p6)
}
 0x686   : > { %s2106_s7 = scalar_lea.hbm %s2612_s11, 512  ;;  %s2110_s30 = scalar_lea.hbm %s2665_s6, 1024 }
 0x687   : > { %p2107_p4 = scmp.ne.s32.totalorder %s2612_s11, %s2106_s7  ;;  %p2111_p12 = scmp.lt.s32.totalorder %s2612_s11, %s2665_s6 }
 0x688   : > { %p2112_p11 = scmp.lt.s32.totalorder %s2110_s30, %s2106_s7 }
 0x689   : > { %p2108_p9 = pnand %p2107_p4, %p2687_p5 }
 0x68a   : > { %p2113_p8 = por %p2112_p11, %p2111_p12 }
 0x68b   : > { %p2109_p10 = pneg %p2108_p9 }
 0x68d   : > { %p2114_p13 = pnand %p2113_p8, %p2109_p10 }
 0x68f   : > { %2117 = shalt.err (!%p2114_p13)
}
 0x690   : > { %s2182_s27 = smov 128  }
 0x691   : > { %1816 = dma.vmem_to_hbm [thread:$0]  (%p2687_p5), %s2614_s20, 512, %s2612_s11, %s1330_s16, %s2182_s27, %s2182_s27, %s2179_s8  }
 0x692 PF: > { %s1358_s17 = sand.u32 1, %s2152_s21   ;;  %p2688_p1 = scmp.ne.s32.totalorder %s2673_s28, 0 }
 0x693   : > { %p2689_p0 = scmp.ge.s32.totalorder %s2164_s24, 2  ;;  %s1359_s25 = scalar_lea.sflag [#allocation6], %s1358_s17 }
 0x695   : > { %p1836_p3 = pnand %p2689_p0, %p2688_p1 }
 0x697   : > { %p1837_p2 = pneg %p1836_p3 }
 0x699   : > { %2147 = dma.done.wait (%p1837_p2), %s1359_s25, 512  }
 0x69a   : > { %2149 = vsyncadd (%p1837_p2), %s1359_s25, 4294966784  ;;  %p21_p7 = scmp.ge.s32.totalorder %s2316_s12, 4   ;;  %s2690_s21 = smov %s2156_s22 }
 0x69b   : > { %s2691_s22 = smov %s2160_s23  ;;  %s2692_s23 = smov %s2332_s19 }
 0x69c   : > { %s2693_s24 = smov %s2316_s12  ;;  %23 = sbr.rel (!%p21_p7) target bundleno = 7 (0x7), region = 115 }
 0x6a1   :  { %1364 = vsyncpa [#allocation5], 1 }
 0x6a2   :  { %1366 = vsyncpa [#allocation5 + $0x1], 1 }
 0x6a3   :  { %1367 = vsyncpa [#allocation8], 1 }
 0x6a4   :  { %1368 = vsyncpa [#allocation11], 1 }
 0x6a5   :  { %1369 = vsyncpa [#allocation6], 1 }
 0x6a6   :  { %1371 = vsyncpa [#allocation6 + $0x1], 1 }

</bundles_post_ra>
